<compile_context>
chip_gen: v6e
topology: v6e:2x2x1
jax: 0.10.0
libtpu: 0.0.40
codegen_flags: <defaults>
</compile_context>

<pallas_src>
import jax
import jax.numpy as jnp
from jax import lax
from jax.experimental import pallas as pl
from jax.experimental.pallas import tpu as pltpu

_LANE = 128


def _sort_pool_kernel(cnt_ref, x_ref, o_ref):
    # cnt_ref: (1, GB)     int32  valid-node count per graph (graphs on lanes)
    # x_ref:   (N, D, GB)  dense node features, graphs on lanes, padded slots 0
    # o_ref:   (k*D, GB)   flattened top-k rows (transposed), graphs on lanes
    n, d, gb = x_ref.shape
    k = o_ref.shape[0] // d

    cnt = cnt_ref[...]                                        # (1, GB) int32

    # Sort key = last feature channel.  Keys live as (N, GB): N on sublanes,
    # graphs on lanes -> every VPU/XLU op below uses the full 128 lanes.
    keys = x_ref[:, d - 1:d, :][:, 0, :].astype(jnp.float32)  # (N, GB)
    iota_n = lax.broadcasted_iota(jnp.int32, (n, gb), 0)      # node index
    neg_inf = jnp.float32(-jnp.inf)
    keys = jnp.where(iota_n < cnt, keys, neg_inf)             # mask padded rows

    # k arg-max passes (stable: lowest original index wins ties).  The gather
    # is fused as a VPU mask-and-reduce and written straight into the output
    # slab; each store covers all GB lanes (no masked partial-lane stores).
    # Selection is gated by (cnt > r), reproducing PyG's zero-padding for
    # graphs with fewer than k nodes.
    # TODO(synk): if k grows well beyond ~8, switch this static unroll to
    # lax.fori_loop(..., unroll=True) to bound vreg live ranges.
    for r in range(k):
        m = jnp.max(keys, axis=0, keepdims=True)                      # (1, GB)
        win = jnp.min(jnp.where(keys == m, iota_n, n),
                      axis=0, keepdims=True)                          # (1, GB)
        sel = (iota_n == win) & (cnt > r)                             # (N, GB)

        xr = x_ref[...]                                               # (N, D, GB)
        picked = jnp.where(sel[:, None, :], xr, jnp.zeros((), xr.dtype))
        row = jnp.sum(picked, axis=0)                                 # (D, GB), exact (one-hot)

        o_ref[r * d:(r + 1) * d, :] = row.astype(o_ref.dtype)         # lane-dense store
        keys = jnp.where(sel, neg_inf, keys)


def _vmem_budget_bytes():
    # Generation-aware budget: ~65% of per-core VMEM (v7x: 64 MiB -> ~41 MiB;
    # v5e/v6e: 128 MiB -> ~83 MiB), capped well below physical.
    try:
        cap = int(pltpu.get_tpu_info().vmem_capacity_bytes)
    except Exception:
        cap = 64 * 1024 * 1024  # conservative: v7x per-TensorCore size
    return min(int(cap * 0.65), 96 * 1024 * 1024)


def _choose_graphs_per_block(num_graphs, d, n_pad, k, itemsize, vmem_budget):
    # Resident VMEM bytes per graph column:
    #   2x double-buffered input block  : 2 * n_pad * d * itemsize
    #   2x double-buffered output block : 2 * k * d * itemsize
    #   counts (double-buffered)        : 2 * 4
    #   in-kernel f32 temporaries       : ~4 * (4 * n_pad + 2 * d)
    per_graph = (2 * (n_pad * d + k * d) * itemsize
                 + 8
                 + 4 * (4 * n_pad + 2 * d))
    gb = vmem_budget // max(per_graph, 1)
    gb = max(_LANE, (gb // _LANE) * _LANE)

    b_lane = -(-num_graphs // _LANE) * _LANE           # graphs rounded to lanes
    gb = min(gb, b_lane)
    # Keep >= 2 "parallel" grid steps when there is enough work (v7x: 2 TCs).
    if b_lane >= 2 * _LANE:
        gb = min(gb, max(_LANE, ((b_lane // 2) // _LANE) * _LANE))
    b_pad = -(-b_lane // gb) * gb                      # grid divides evenly
    return gb, b_pad


def global_sort_pool_pallas(x, batch, num_graphs, k, n_pad=None,
                            graphs_per_block=None):
    """x: (num_nodes, D) float; batch: (num_nodes,) int32, sorted ascending."""
    num_nodes, d = x.shape

    # Per-graph node counts; also used to validate n_pad (silent drop fix).
    counts_g = jnp.zeros((num_graphs,), jnp.int32).at[batch].add(1)
    try:
        max_nodes = int(jnp.max(counts_g)) if num_nodes > 0 else 0
    except Exception:  # traced (inside jit) -> cannot check eagerly
        max_nodes = None
    if n_pad is None:
        if max_nodes is None:
            raise ValueError("n_pad must be provided when called under tracing")
        n_pad = max(max_nodes, 1)
    elif max_nodes is not None and max_nodes > n_pad:
        raise ValueError(
            f"n_pad={n_pad} is smaller than the largest graph ({max_nodes} "
            "nodes); nodes would be silently dropped")
    n_pad = max(int(n_pad), 1)

    itemsize = jnp.dtype(x.dtype).itemsize
    vmem_budget = _vmem_budget_bytes()
    if graphs_per_block is None:
        gb, b_pad = _choose_graphs_per_block(num_graphs, d, n_pad, k,
                                             itemsize, vmem_budget)
    else:
        gb = int(graphs_per_block)
        assert gb % _LANE == 0, "graphs_per_block must be a multiple of 128"
        b_pad = -(-max(num_graphs, 1) // gb) * gb

    # ---- glue: dense batching in XLA --------------------------------------
    # Contiguous D-length row scatter into (B, N, D), then one XLA transpose
    # to the kernel's (N, D, B) graphs-on-lanes layout.
    start = jnp.searchsorted(batch, jnp.arange(num_graphs))
    pos = jnp.arange(num_nodes) - start[batch]
    dense = jnp.zeros((b_pad, n_pad, d), x.dtype).at[batch, pos].set(x)
    dense_t = jnp.transpose(dense, (1, 2, 0))                  # (N, D, B)
    cnt = jnp.zeros((1, b_pad), jnp.int32).at[0, batch].add(1)  # (1, B)

    # NOTE: if per-step DMA becomes the exposed cost at large blocks, bump the
    # x BlockSpec to pipeline_mode=pl.Buffered(3) (re-check VMEM on v7x).
    out_t = pl.pallas_call(
        _sort_pool_kernel,
        out_shape=jax.ShapeDtypeStruct((k * d, b_pad), x.dtype),
        grid=(b_pad // gb,),
        in_specs=[
            pl.BlockSpec((1, gb), lambda i: (0, i)),
            pl.BlockSpec((n_pad, d, gb), lambda i: (0, 0, i)),
        ],
        out_specs=pl.BlockSpec((k * d, gb), lambda i: (0, i)),
        compiler_params=pltpu.CompilerParams(
            dimension_semantics=("parallel",),
            vmem_limit_bytes=int(vmem_budget),
        ),
    )(cnt, dense_t)

    return jnp.transpose(out_t)[:num_graphs]                   # (B, k*D)


def _reference(x, batch, num_graphs, k, n_pad):
    # plain-JAX reference mirroring torch_geometric.global_sort_pool
    num_nodes, d = x.shape
    start = jnp.searchsorted(batch, jnp.arange(num_graphs))
    pos = jnp.arange(num_nodes) - start[batch]
    dense_x = jnp.zeros((num_graphs, n_pad, d), x.dtype).at[batch, pos].set(x)
    mask = jnp.zeros((num_graphs, n_pad), bool).at[batch, pos].set(True)
    fill = x.min() - jnp.asarray(1.0, x.dtype)
    keys = jnp.where(mask, dense_x[:, :, -1], fill)
    order = jnp.argsort(-keys, axis=1, stable=True)[:, :k]        # descending, stable
    top = jnp.take_along_axis(dense_x, order[:, :, None], axis=1)  # padded rows zero
    return top.reshape(num_graphs, k * d)


if __name__ == "__main__":
    key = jax.random.PRNGKey(0)

    # synthetic graph batch: 16 graphs (several with fewer than k nodes),
    # 16 channels, k = 8  ->  output row width k*D = 128.
    in_channels = 16
    k = 8
    counts = [7, 12, 3, 9, 16, 5, 11, 2, 8, 14, 6, 10, 4, 13, 1, 9]
    num_graphs = len(counts)
    num_nodes = sum(counts)
    n_pad = max(counts)          # >= max nodes per graph (and >= k here)

    x = jax.random.normal(key, (num_nodes, in_channels), dtype=jnp.float32)
    batch = jnp.concatenate(
        [jnp.full((c,), g, dtype=jnp.int32) for g, c in enumerate(counts)]
    )

    out = global_sort_pool_pallas(x, batch, num_graphs, k, n_pad=n_pad)
    out = jax.block_until_ready(out)

    ref = _reference(x, batch, num_graphs, k, n_pad)
    assert out.shape == (num_graphs, k * in_channels), out.shape
    assert jnp.allclose(out, ref, atol=1e-6), "mismatch vs reference"

    print("KERNEL_OK")
</pallas_src>

<mosaic_0001>
module attributes {stable_mosaic.version = 11 : i64} {
  func.func @_sort_pool_kernel(%arg0: i32, %arg1: memref<1x128xi32, #tpu.memory_space<vmem>>, %arg2: memref<16x16x128xf32, #tpu.memory_space<vmem>>, %arg3: memref<128x128xf32, #tpu.memory_space<vmem>>) attributes {dimension_semantics = [#tpu.dimension_semantics<parallel>], iteration_bounds = array<i64: 1>, scalar_prefetch = 0 : i64, scratch_operands = 0 : i64, tpu.core_type = #tpu.core_type<tc>, window_params = [{transform_indices = @transform_0, window_bounds = array<i64: 1, 128>}, {transform_indices = @transform_1, window_bounds = array<i64: 16, 16, 128>}, {transform_indices = @transform_2, window_bounds = array<i64: 128, 128>}]} {
    %c0 = arith.constant 0 : index
    %c0_0 = arith.constant 0 : index
    %0 = vector.load %arg1[%c0, %c0_0] : memref<1x128xi32, #tpu.memory_space<vmem>>, vector<1x128xi32>
    %c0_1 = arith.constant 0 : index
    %c15 = arith.constant 15 : index
    %c0_2 = arith.constant 0 : index
    %1 = vector.load %arg2[%c0_1, %c15, %c0_2] : memref<16x16x128xf32, #tpu.memory_space<vmem>>, vector<16x1x128xf32>
    %2 = vector.shape_cast %1 : vector<16x1x128xf32> to vector<16x128xf32>
    %3 = tpu.iota {dimensions = array<i32: 0>} : vector<16x128xi32>
    %4 = vector.broadcast %0 : vector<1x128xi32> to vector<16x128xi32>
    %5 = arith.cmpi slt, %3, %4 : vector<16x128xi32>
    %cst = arith.constant 0xFF800000 : f32
    %6 = vector.broadcast %cst : f32 to vector<16x128xf32>
    %7 = arith.select %5, %2, %6 : vector<16x128xi1>, vector<16x128xf32>
    %cst_3 = arith.constant dense<0xFF800000> : vector<128xf32>
    %8 = vector.multi_reduction <maximumf>, %7, %cst_3 [0] : vector<16x128xf32> to vector<128xf32>
    %9 = vector.shape_cast %8 : vector<128xf32> to vector<1x128xf32>
    %10 = vector.broadcast %9 : vector<1x128xf32> to vector<16x128xf32>
    %11 = arith.cmpf oeq, %7, %10 : vector<16x128xf32>
    %c16_i32 = arith.constant 16 : i32
    %12 = vector.broadcast %c16_i32 : i32 to vector<16x128xi32>
    %13 = arith.select %11, %3, %12 : vector<16x128xi1>, vector<16x128xi32>
    %cst_4 = arith.constant dense<2147483647> : vector<128xi32>
    %14 = vector.multi_reduction <minsi>, %13, %cst_4 [0] : vector<16x128xi32> to vector<128xi32>
    %15 = vector.shape_cast %14 : vector<128xi32> to vector<1x128xi32>
    %16 = vector.broadcast %15 : vector<1x128xi32> to vector<16x128xi32>
    %17 = arith.cmpi eq, %3, %16 : vector<16x128xi32>
    %c0_i32 = arith.constant 0 : i32
    %18 = vector.broadcast %c0_i32 : i32 to vector<1x128xi32>
    %19 = arith.cmpi sgt, %0, %18 : vector<1x128xi32>
    %20 = vector.broadcast %19 : vector<1x128xi1> to vector<16x128xi1>
    %21 = arith.andi %17, %20 : vector<16x128xi1>
    %c0_5 = arith.constant 0 : index
    %c0_6 = arith.constant 0 : index
    %c0_7 = arith.constant 0 : index
    %22 = vector.load %arg2[%c0_5, %c0_6, %c0_7] : memref<16x16x128xf32, #tpu.memory_space<vmem>>, vector<16x16x128xf32>
    %23 = vector.shape_cast %21 : vector<16x128xi1> to vector<16x1x128xi1>
    %cst_8 = arith.constant 0.000000e+00 : f32
    %24 = vector.shape_cast %23 : vector<16x1x128xi1> to vector<16x1x128xi1>
    %25 = vector.broadcast %24 : vector<16x1x128xi1> to vector<16x16x128xi1>
    %26 = vector.broadcast %cst_8 : f32 to vector<16x16x128xf32>
    %27 = arith.select %25, %22, %26 : vector<16x16x128xi1>, vector<16x16x128xf32>
    %cst_9 = arith.constant dense<0.000000e+00> : vector<16x128xf32>
    %28 = vector.multi_reduction <add>, %27, %cst_9 [0] : vector<16x16x128xf32> to vector<16x128xf32>
    %c0_10 = arith.constant 0 : index
    %c0_11 = arith.constant 0 : index
    %29 = vector.load %arg3[%c0_10, %c0_11] : memref<128x128xf32, #tpu.memory_space<vmem>>, vector<16x128xf32>
    tpu.vector_store %arg3[%c0_10, %c0_11], %28 {strides = array<i32>} : memref<128x128xf32, #tpu.memory_space<vmem>>, vector<16x128xf32>,
    %cst_12 = arith.constant 0xFF800000 : f32
    %30 = vector.broadcast %cst_12 : f32 to vector<16x128xf32>
    %31 = arith.select %21, %30, %7 : vector<16x128xi1>, vector<16x128xf32>
    %cst_13 = arith.constant dense<0xFF800000> : vector<128xf32>
    %32 = vector.multi_reduction <maximumf>, %31, %cst_13 [0] : vector<16x128xf32> to vector<128xf32>
    %33 = vector.shape_cast %32 : vector<128xf32> to vector<1x128xf32>
    %34 = vector.broadcast %33 : vector<1x128xf32> to vector<16x128xf32>
    %35 = arith.cmpf oeq, %31, %34 : vector<16x128xf32>
    %c16_i32_14 = arith.constant 16 : i32
    %36 = vector.broadcast %c16_i32_14 : i32 to vector<16x128xi32>
    %37 = arith.select %35, %3, %36 : vector<16x128xi1>, vector<16x128xi32>
    %cst_15 = arith.constant dense<2147483647> : vector<128xi32>
    %38 = vector.multi_reduction <minsi>, %37, %cst_15 [0] : vector<16x128xi32> to vector<128xi32>
    %39 = vector.shape_cast %38 : vector<128xi32> to vector<1x128xi32>
    %40 = vector.broadcast %39 : vector<1x128xi32> to vector<16x128xi32>
    %41 = arith.cmpi eq, %3, %40 : vector<16x128xi32>
    %c1_i32 = arith.constant 1 : i32
    %42 = vector.broadcast %c1_i32 : i32 to vector<1x128xi32>
    %43 = arith.cmpi sgt, %0, %42 : vector<1x128xi32>
    %44 = vector.broadcast %43 : vector<1x128xi1> to vector<16x128xi1>
    %45 = arith.andi %41, %44 : vector<16x128xi1>
    %c0_16 = arith.constant 0 : index
    %c0_17 = arith.constant 0 : index
    %c0_18 = arith.constant 0 : index
    %46 = vector.load %arg2[%c0_16, %c0_17, %c0_18] : memref<16x16x128xf32, #tpu.memory_space<vmem>>, vector<16x16x128xf32>
    %47 = vector.shape_cast %45 : vector<16x128xi1> to vector<16x1x128xi1>
    %cst_19 = arith.constant 0.000000e+00 : f32
    %48 = vector.shape_cast %47 : vector<16x1x128xi1> to vector<16x1x128xi1>
    %49 = vector.broadcast %48 : vector<16x1x128xi1> to vector<16x16x128xi1>
    %50 = vector.broadcast %cst_19 : f32 to vector<16x16x128xf32>
    %51 = arith.select %49, %46, %50 : vector<16x16x128xi1>, vector<16x16x128xf32>
    %cst_20 = arith.constant dense<0.000000e+00> : vector<16x128xf32>
    %52 = vector.multi_reduction <add>, %51, %cst_20 [0] : vector<16x16x128xf32> to vector<16x128xf32>
    %c16 = arith.constant 16 : index
    %c0_21 = arith.constant 0 : index
    %53 = vector.load %arg3[%c16, %c0_21] : memref<128x128xf32, #tpu.memory_space<vmem>>, vector<16x128xf32>
    tpu.vector_store %arg3[%c16, %c0_21], %52 {strides = array<i32>} : memref<128x128xf32, #tpu.memory_space<vmem>>, vector<16x128xf32>,
    %cst_22 = arith.constant 0xFF800000 : f32
    %54 = vector.broadcast %cst_22 : f32 to vector<16x128xf32>
    %55 = arith.select %45, %54, %31 : vector<16x128xi1>, vector<16x128xf32>
    %cst_23 = arith.constant dense<0xFF800000> : vector<128xf32>
    %56 = vector.multi_reduction <maximumf>, %55, %cst_23 [0] : vector<16x128xf32> to vector<128xf32>
    %57 = vector.shape_cast %56 : vector<128xf32> to vector<1x128xf32>
    %58 = vector.broadcast %57 : vector<1x128xf32> to vector<16x128xf32>
    %59 = arith.cmpf oeq, %55, %58 : vector<16x128xf32>
    %c16_i32_24 = arith.constant 16 : i32
    %60 = vector.broadcast %c16_i32_24 : i32 to vector<16x128xi32>
    %61 = arith.select %59, %3, %60 : vector<16x128xi1>, vector<16x128xi32>
    %cst_25 = arith.constant dense<2147483647> : vector<128xi32>
    %62 = vector.multi_reduction <minsi>, %61, %cst_25 [0] : vector<16x128xi32> to vector<128xi32>
    %63 = vector.shape_cast %62 : vector<128xi32> to vector<1x128xi32>
    %64 = vector.broadcast %63 : vector<1x128xi32> to vector<16x128xi32>
    %65 = arith.cmpi eq, %3, %64 : vector<16x128xi32>
    %c2_i32 = arith.constant 2 : i32
    %66 = vector.broadcast %c2_i32 : i32 to vector<1x128xi32>
    %67 = arith.cmpi sgt, %0, %66 : vector<1x128xi32>
    %68 = vector.broadcast %67 : vector<1x128xi1> to vector<16x128xi1>
    %69 = arith.andi %65, %68 : vector<16x128xi1>
    %c0_26 = arith.constant 0 : index
    %c0_27 = arith.constant 0 : index
    %c0_28 = arith.constant 0 : index
    %70 = vector.load %arg2[%c0_26, %c0_27, %c0_28] : memref<16x16x128xf32, #tpu.memory_space<vmem>>, vector<16x16x128xf32>
    %71 = vector.shape_cast %69 : vector<16x128xi1> to vector<16x1x128xi1>
    %cst_29 = arith.constant 0.000000e+00 : f32
    %72 = vector.shape_cast %71 : vector<16x1x128xi1> to vector<16x1x128xi1>
    %73 = vector.broadcast %72 : vector<16x1x128xi1> to vector<16x16x128xi1>
    %74 = vector.broadcast %cst_29 : f32 to vector<16x16x128xf32>
    %75 = arith.select %73, %70, %74 : vector<16x16x128xi1>, vector<16x16x128xf32>
    %cst_30 = arith.constant dense<0.000000e+00> : vector<16x128xf32>
    %76 = vector.multi_reduction <add>, %75, %cst_30 [0] : vector<16x16x128xf32> to vector<16x128xf32>
    %c32 = arith.constant 32 : index
    %c0_31 = arith.constant 0 : index
    %77 = vector.load %arg3[%c32, %c0_31] : memref<128x128xf32, #tpu.memory_space<vmem>>, vector<16x128xf32>
    tpu.vector_store %arg3[%c32, %c0_31], %76 {strides = array<i32>} : memref<128x128xf32, #tpu.memory_space<vmem>>, vector<16x128xf32>,
    %cst_32 = arith.constant 0xFF800000 : f32
    %78 = vector.broadcast %cst_32 : f32 to vector<16x128xf32>
    %79 = arith.select %69, %78, %55 : vector<16x128xi1>, vector<16x128xf32>
    %cst_33 = arith.constant dense<0xFF800000> : vector<128xf32>
    %80 = vector.multi_reduction <maximumf>, %79, %cst_33 [0] : vector<16x128xf32> to vector<128xf32>
    %81 = vector.shape_cast %80 : vector<128xf32> to vector<1x128xf32>
    %82 = vector.broadcast %81 : vector<1x128xf32> to vector<16x128xf32>
    %83 = arith.cmpf oeq, %79, %82 : vector<16x128xf32>
    %c16_i32_34 = arith.constant 16 : i32
    %84 = vector.broadcast %c16_i32_34 : i32 to vector<16x128xi32>
    %85 = arith.select %83, %3, %84 : vector<16x128xi1>, vector<16x128xi32>
    %cst_35 = arith.constant dense<2147483647> : vector<128xi32>
    %86 = vector.multi_reduction <minsi>, %85, %cst_35 [0] : vector<16x128xi32> to vector<128xi32>
    %87 = vector.shape_cast %86 : vector<128xi32> to vector<1x128xi32>
    %88 = vector.broadcast %87 : vector<1x128xi32> to vector<16x128xi32>
    %89 = arith.cmpi eq, %3, %88 : vector<16x128xi32>
    %c3_i32 = arith.constant 3 : i32
    %90 = vector.broadcast %c3_i32 : i32 to vector<1x128xi32>
    %91 = arith.cmpi sgt, %0, %90 : vector<1x128xi32>
    %92 = vector.broadcast %91 : vector<1x128xi1> to vector<16x128xi1>
    %93 = arith.andi %89, %92 : vector<16x128xi1>
    %c0_36 = arith.constant 0 : index
    %c0_37 = arith.constant 0 : index
    %c0_38 = arith.constant 0 : index
    %94 = vector.load %arg2[%c0_36, %c0_37, %c0_38] : memref<16x16x128xf32, #tpu.memory_space<vmem>>, vector<16x16x128xf32>
    %95 = vector.shape_cast %93 : vector<16x128xi1> to vector<16x1x128xi1>
    %cst_39 = arith.constant 0.000000e+00 : f32
    %96 = vector.shape_cast %95 : vector<16x1x128xi1> to vector<16x1x128xi1>
    %97 = vector.broadcast %96 : vector<16x1x128xi1> to vector<16x16x128xi1>
    %98 = vector.broadcast %cst_39 : f32 to vector<16x16x128xf32>
    %99 = arith.select %97, %94, %98 : vector<16x16x128xi1>, vector<16x16x128xf32>
    %cst_40 = arith.constant dense<0.000000e+00> : vector<16x128xf32>
    %100 = vector.multi_reduction <add>, %99, %cst_40 [0] : vector<16x16x128xf32> to vector<16x128xf32>
    %c48 = arith.constant 48 : index
    %c0_41 = arith.constant 0 : index
    %101 = vector.load %arg3[%c48, %c0_41] : memref<128x128xf32, #tpu.memory_space<vmem>>, vector<16x128xf32>
    tpu.vector_store %arg3[%c48, %c0_41], %100 {strides = array<i32>} : memref<128x128xf32, #tpu.memory_space<vmem>>, vector<16x128xf32>,
    %cst_42 = arith.constant 0xFF800000 : f32
    %102 = vector.broadcast %cst_42 : f32 to vector<16x128xf32>
    %103 = arith.select %93, %102, %79 : vector<16x128xi1>, vector<16x128xf32>
    %cst_43 = arith.constant dense<0xFF800000> : vector<128xf32>
    %104 = vector.multi_reduction <maximumf>, %103, %cst_43 [0] : vector<16x128xf32> to vector<128xf32>
    %105 = vector.shape_cast %104 : vector<128xf32> to vector<1x128xf32>
    %106 = vector.broadcast %105 : vector<1x128xf32> to vector<16x128xf32>
    %107 = arith.cmpf oeq, %103, %106 : vector<16x128xf32>
    %c16_i32_44 = arith.constant 16 : i32
    %108 = vector.broadcast %c16_i32_44 : i32 to vector<16x128xi32>
    %109 = arith.select %107, %3, %108 : vector<16x128xi1>, vector<16x128xi32>
    %cst_45 = arith.constant dense<2147483647> : vector<128xi32>
    %110 = vector.multi_reduction <minsi>, %109, %cst_45 [0] : vector<16x128xi32> to vector<128xi32>
    %111 = vector.shape_cast %110 : vector<128xi32> to vector<1x128xi32>
    %112 = vector.broadcast %111 : vector<1x128xi32> to vector<16x128xi32>
    %113 = arith.cmpi eq, %3, %112 : vector<16x128xi32>
    %c4_i32 = arith.constant 4 : i32
    %114 = vector.broadcast %c4_i32 : i32 to vector<1x128xi32>
    %115 = arith.cmpi sgt, %0, %114 : vector<1x128xi32>
    %116 = vector.broadcast %115 : vector<1x128xi1> to vector<16x128xi1>
    %117 = arith.andi %113, %116 : vector<16x128xi1>
    %c0_46 = arith.constant 0 : index
    %c0_47 = arith.constant 0 : index
    %c0_48 = arith.constant 0 : index
    %118 = vector.load %arg2[%c0_46, %c0_47, %c0_48] : memref<16x16x128xf32, #tpu.memory_space<vmem>>, vector<16x16x128xf32>
    %119 = vector.shape_cast %117 : vector<16x128xi1> to vector<16x1x128xi1>
    %cst_49 = arith.constant 0.000000e+00 : f32
    %120 = vector.shape_cast %119 : vector<16x1x128xi1> to vector<16x1x128xi1>
    %121 = vector.broadcast %120 : vector<16x1x128xi1> to vector<16x16x128xi1>
    %122 = vector.broadcast %cst_49 : f32 to vector<16x16x128xf32>
    %123 = arith.select %121, %118, %122 : vector<16x16x128xi1>, vector<16x16x128xf32>
    %cst_50 = arith.constant dense<0.000000e+00> : vector<16x128xf32>
    %124 = vector.multi_reduction <add>, %123, %cst_50 [0] : vector<16x16x128xf32> to vector<16x128xf32>
    %c64 = arith.constant 64 : index
    %c0_51 = arith.constant 0 : index
    %125 = vector.load %arg3[%c64, %c0_51] : memref<128x128xf32, #tpu.memory_space<vmem>>, vector<16x128xf32>
    tpu.vector_store %arg3[%c64, %c0_51], %124 {strides = array<i32>} : memref<128x128xf32, #tpu.memory_space<vmem>>, vector<16x128xf32>,
    %cst_52 = arith.constant 0xFF800000 : f32
    %126 = vector.broadcast %cst_52 : f32 to vector<16x128xf32>
    %127 = arith.select %117, %126, %103 : vector<16x128xi1>, vector<16x128xf32>
    %cst_53 = arith.constant dense<0xFF800000> : vector<128xf32>
    %128 = vector.multi_reduction <maximumf>, %127, %cst_53 [0] : vector<16x128xf32> to vector<128xf32>
    %129 = vector.shape_cast %128 : vector<128xf32> to vector<1x128xf32>
    %130 = vector.broadcast %129 : vector<1x128xf32> to vector<16x128xf32>
    %131 = arith.cmpf oeq, %127, %130 : vector<16x128xf32>
    %c16_i32_54 = arith.constant 16 : i32
    %132 = vector.broadcast %c16_i32_54 : i32 to vector<16x128xi32>
    %133 = arith.select %131, %3, %132 : vector<16x128xi1>, vector<16x128xi32>
    %cst_55 = arith.constant dense<2147483647> : vector<128xi32>
    %134 = vector.multi_reduction <minsi>, %133, %cst_55 [0] : vector<16x128xi32> to vector<128xi32>
    %135 = vector.shape_cast %134 : vector<128xi32> to vector<1x128xi32>
    %136 = vector.broadcast %135 : vector<1x128xi32> to vector<16x128xi32>
    %137 = arith.cmpi eq, %3, %136 : vector<16x128xi32>
    %c5_i32 = arith.constant 5 : i32
    %138 = vector.broadcast %c5_i32 : i32 to vector<1x128xi32>
    %139 = arith.cmpi sgt, %0, %138 : vector<1x128xi32>
    %140 = vector.broadcast %139 : vector<1x128xi1> to vector<16x128xi1>
    %141 = arith.andi %137, %140 : vector<16x128xi1>
    %c0_56 = arith.constant 0 : index
    %c0_57 = arith.constant 0 : index
    %c0_58 = arith.constant 0 : index
    %142 = vector.load %arg2[%c0_56, %c0_57, %c0_58] : memref<16x16x128xf32, #tpu.memory_space<vmem>>, vector<16x16x128xf32>
    %143 = vector.shape_cast %141 : vector<16x128xi1> to vector<16x1x128xi1>
    %cst_59 = arith.constant 0.000000e+00 : f32
    %144 = vector.shape_cast %143 : vector<16x1x128xi1> to vector<16x1x128xi1>
    %145 = vector.broadcast %144 : vector<16x1x128xi1> to vector<16x16x128xi1>
    %146 = vector.broadcast %cst_59 : f32 to vector<16x16x128xf32>
    %147 = arith.select %145, %142, %146 : vector<16x16x128xi1>, vector<16x16x128xf32>
    %cst_60 = arith.constant dense<0.000000e+00> : vector<16x128xf32>
    %148 = vector.multi_reduction <add>, %147, %cst_60 [0] : vector<16x16x128xf32> to vector<16x128xf32>
    %c80 = arith.constant 80 : index
    %c0_61 = arith.constant 0 : index
    %149 = vector.load %arg3[%c80, %c0_61] : memref<128x128xf32, #tpu.memory_space<vmem>>, vector<16x128xf32>
    tpu.vector_store %arg3[%c80, %c0_61], %148 {strides = array<i32>} : memref<128x128xf32, #tpu.memory_space<vmem>>, vector<16x128xf32>,
    %cst_62 = arith.constant 0xFF800000 : f32
    %150 = vector.broadcast %cst_62 : f32 to vector<16x128xf32>
    %151 = arith.select %141, %150, %127 : vector<16x128xi1>, vector<16x128xf32>
    %cst_63 = arith.constant dense<0xFF800000> : vector<128xf32>
    %152 = vector.multi_reduction <maximumf>, %151, %cst_63 [0] : vector<16x128xf32> to vector<128xf32>
    %153 = vector.shape_cast %152 : vector<128xf32> to vector<1x128xf32>
    %154 = vector.broadcast %153 : vector<1x128xf32> to vector<16x128xf32>
    %155 = arith.cmpf oeq, %151, %154 : vector<16x128xf32>
    %c16_i32_64 = arith.constant 16 : i32
    %156 = vector.broadcast %c16_i32_64 : i32 to vector<16x128xi32>
    %157 = arith.select %155, %3, %156 : vector<16x128xi1>, vector<16x128xi32>
    %cst_65 = arith.constant dense<2147483647> : vector<128xi32>
    %158 = vector.multi_reduction <minsi>, %157, %cst_65 [0] : vector<16x128xi32> to vector<128xi32>
    %159 = vector.shape_cast %158 : vector<128xi32> to vector<1x128xi32>
    %160 = vector.broadcast %159 : vector<1x128xi32> to vector<16x128xi32>
    %161 = arith.cmpi eq, %3, %160 : vector<16x128xi32>
    %c6_i32 = arith.constant 6 : i32
    %162 = vector.broadcast %c6_i32 : i32 to vector<1x128xi32>
    %163 = arith.cmpi sgt, %0, %162 : vector<1x128xi32>
    %164 = vector.broadcast %163 : vector<1x128xi1> to vector<16x128xi1>
    %165 = arith.andi %161, %164 : vector<16x128xi1>
    %c0_66 = arith.constant 0 : index
    %c0_67 = arith.constant 0 : index
    %c0_68 = arith.constant 0 : index
    %166 = vector.load %arg2[%c0_66, %c0_67, %c0_68] : memref<16x16x128xf32, #tpu.memory_space<vmem>>, vector<16x16x128xf32>
    %167 = vector.shape_cast %165 : vector<16x128xi1> to vector<16x1x128xi1>
    %cst_69 = arith.constant 0.000000e+00 : f32
    %168 = vector.shape_cast %167 : vector<16x1x128xi1> to vector<16x1x128xi1>
    %169 = vector.broadcast %168 : vector<16x1x128xi1> to vector<16x16x128xi1>
    %170 = vector.broadcast %cst_69 : f32 to vector<16x16x128xf32>
    %171 = arith.select %169, %166, %170 : vector<16x16x128xi1>, vector<16x16x128xf32>
    %cst_70 = arith.constant dense<0.000000e+00> : vector<16x128xf32>
    %172 = vector.multi_reduction <add>, %171, %cst_70 [0] : vector<16x16x128xf32> to vector<16x128xf32>
    %c96 = arith.constant 96 : index
    %c0_71 = arith.constant 0 : index
    %173 = vector.load %arg3[%c96, %c0_71] : memref<128x128xf32, #tpu.memory_space<vmem>>, vector<16x128xf32>
    tpu.vector_store %arg3[%c96, %c0_71], %172 {strides = array<i32>} : memref<128x128xf32, #tpu.memory_space<vmem>>, vector<16x128xf32>,
    %cst_72 = arith.constant 0xFF800000 : f32
    %174 = vector.broadcast %cst_72 : f32 to vector<16x128xf32>
    %175 = arith.select %165, %174, %151 : vector<16x128xi1>, vector<16x128xf32>
    %cst_73 = arith.constant dense<0xFF800000> : vector<128xf32>
    %176 = vector.multi_reduction <maximumf>, %175, %cst_73 [0] : vector<16x128xf32> to vector<128xf32>
    %177 = vector.shape_cast %176 : vector<128xf32> to vector<1x128xf32>
    %178 = vector.broadcast %177 : vector<1x128xf32> to vector<16x128xf32>
    %179 = arith.cmpf oeq, %175, %178 : vector<16x128xf32>
    %c16_i32_74 = arith.constant 16 : i32
    %180 = vector.broadcast %c16_i32_74 : i32 to vector<16x128xi32>
    %181 = arith.select %179, %3, %180 : vector<16x128xi1>, vector<16x128xi32>
    %cst_75 = arith.constant dense<2147483647> : vector<128xi32>
    %182 = vector.multi_reduction <minsi>, %181, %cst_75 [0] : vector<16x128xi32> to vector<128xi32>
    %183 = vector.shape_cast %182 : vector<128xi32> to vector<1x128xi32>
    %184 = vector.broadcast %183 : vector<1x128xi32> to vector<16x128xi32>
    %185 = arith.cmpi eq, %3, %184 : vector<16x128xi32>
    %c7_i32 = arith.constant 7 : i32
    %186 = vector.broadcast %c7_i32 : i32 to vector<1x128xi32>
    %187 = arith.cmpi sgt, %0, %186 : vector<1x128xi32>
    %188 = vector.broadcast %187 : vector<1x128xi1> to vector<16x128xi1>
    %189 = arith.andi %185, %188 : vector<16x128xi1>
    %c0_76 = arith.constant 0 : index
    %c0_77 = arith.constant 0 : index
    %c0_78 = arith.constant 0 : index
    %190 = vector.load %arg2[%c0_76, %c0_77, %c0_78] : memref<16x16x128xf32, #tpu.memory_space<vmem>>, vector<16x16x128xf32>
    %191 = vector.shape_cast %189 : vector<16x128xi1> to vector<16x1x128xi1>
    %cst_79 = arith.constant 0.000000e+00 : f32
    %192 = vector.shape_cast %191 : vector<16x1x128xi1> to vector<16x1x128xi1>
    %193 = vector.broadcast %192 : vector<16x1x128xi1> to vector<16x16x128xi1>
    %194 = vector.broadcast %cst_79 : f32 to vector<16x16x128xf32>
    %195 = arith.select %193, %190, %194 : vector<16x16x128xi1>, vector<16x16x128xf32>
    %cst_80 = arith.constant dense<0.000000e+00> : vector<16x128xf32>
    %196 = vector.multi_reduction <add>, %195, %cst_80 [0] : vector<16x16x128xf32> to vector<16x128xf32>
    %c112 = arith.constant 112 : index
    %c0_81 = arith.constant 0 : index
    %197 = vector.load %arg3[%c112, %c0_81] : memref<128x128xf32, #tpu.memory_space<vmem>>, vector<16x128xf32>
    tpu.vector_store %arg3[%c112, %c0_81], %196 {strides = array<i32>} : memref<128x128xf32, #tpu.memory_space<vmem>>, vector<16x128xf32>,
    return
  }
  func.func @transform_0(%arg0: i32) -> (i32, i32) {
    %c0_i32 = arith.constant 0 : i32
    %c0_i32_0 = arith.constant 0 : i32
    return %c0_i32, %arg0 : i32, i32
  }
  func.func @transform_1(%arg0: i32) -> (i32, i32, i32) {
    %c0_i32 = arith.constant 0 : i32
    %c0_i32_0 = arith.constant 0 : i32
    %c0_i32_1 = arith.constant 0 : i32
    return %c0_i32, %c0_i32_0, %arg0 : i32, i32, i32
  }
  func.func @transform_2(%arg0: i32) -> (i32, i32) {
    %c0_i32 = arith.constant 0 : i32
    %c0_i32_0 = arith.constant 0 : i32
    return %c0_i32, %arg0 : i32, i32
  }
}

</mosaic_0001>

<bundles_post_ra>
// kernel: tpu_custom_call.1
= control target key start
LH: loop header
LB: loop body
LE: loop exit
PB: predicated region body
PF: predicated region fallthrough
CT: control target
= control target key end

     0   :  { %7 = vsyncpa [#allocation3], 0  ;;  %s5489_s0 = inlined_call_operand.hbm [shape: s32[1,128], index: 0, kind: input, shape index: {}]   ;;  %s5490_s1 = inlined_call_operand.hbm [shape: f32[16,16,128], index: 1, kind: input, shape index: {}]   ;;  %s5491_s2 = inlined_call_operand.hbm [shape: f32[128,128], index: 2, kind: output, shape index: {}]  }
   0x1   :  { %8 = vsyncpa [#allocation6], 0 }
   0x2   :  { %9 = vsyncpa [#allocation4], 0  ;;  %s2954_s9 = smov [#allocation2]   ;;  %s2955_s11 = smov [#allocation5]  }
   0x3   :  { %s16_s10 = sshll.u32 %s2954_s9, 4  ;;  %s25_s12 = sshll.u32 %s2955_s11, 4  ;;  %s17_s10 = int_to_ptr.vmem [resolvable:$true] %s16_s10  ;;  %s26_s12 = int_to_ptr.vmem [resolvable:$true] %s25_s12 }
   0x4   :  { %s2896_s13 = scalar_lea.vmem %s17_s10, 16  ;;  %s2900_s14 = scalar_lea.vmem %s17_s10, 32 }
   0x5   :  { %p2897_p0 = scmp.ne.s32.totalorder %s17_s10, %s2896_s13  ;;  %p2901_p1 = scmp.lt.s32.totalorder %s17_s10, %s17_s10 }
   0x6   :  { %p2902_p2 = scmp.lt.s32.totalorder %s2900_s14, %s2896_s13 }
   0x8   :  { %p2903_p3 = por %p2902_p2, %p2901_p1 }
   0xa   :  { %p2904_p4 = pnand %p2903_p3, %p2897_p0 }
   0xc   :  { %2907 = shalt.err (!%p2904_p4)
}
   0xd   :  { %19 = dma.hbm_to_vmem [thread:$0]  %s5489_s0, 16, %s17_s10, [#allocation3]  }
   0xe   :  { %s2916_s17 = scalar_lea.vmem %s26_s12, 4096  ;;  %p2921_p6 = scmp.lt.s32.totalorder %s26_s12, %s26_s12 }
   0xf   :  { %p2917_p5 = scmp.ne.s32.totalorder %s26_s12, %s2916_s17  ;;  %p2922_p7 = scmp.lt.s32.totalorder %s2916_s17, %s2916_s17 }
  0x11   :  { %p2923_p8 = por %p2922_p7, %p2921_p6 }
  0x13   :  { %p2924_p9 = pnand %p2923_p8, %p2917_p5 }
  0x15   :  { %2927 = shalt.err (!%p2924_p9)
}
  0x16   :  { %s2956_s18 = smov 128   ;;  %s2957_s19 = smov 8  }
  0x17   :  { %31 = dma.hbm_to_vmem [thread:$0]  %s5490_s1, 4096, %s26_s12, [#allocation6], %s2956_s18, %s2956_s18, %s2957_s19  }
  0x18   :  { %2948 = dma.done.wait [#allocation3], 16  }
  0x19   :  { %2949 = vsyncadd [#allocation3], 4294967280 }
  0x1a   :  { %2950 = dma.done.wait [#allocation6], 4096  }
  0x1b   :  { %2951 = vsyncadd [#allocation6], 4294963200  ;;  %v55_v0 = vlaneseq  ;;  %vm81_vm0 = vcmask 1041409   ;;  %vm84_vm1 = vcmask 1042434   ;;  %vm87_vm2 = vcmask 1043459   ;;  %s2960_s0 = smov [#allocation7]  }
  0x1c   :  { %vm90_vm3 = vcmask 1044484   ;;  %v2987_v2 = vld [vmem:[#allocation2] sm:$0x1]  ;;  %vm93_vm4 = vcmask 1045509   ;;  %vm96_vm5 = vcmask 1046534   ;;  %vm99_vm6 = vcmask 1047559  }
  0x1d   :  { %v2985_v1 = vshrl.u32 %v55_v0, 7  ;;  %v39_v5 = vld [vmem:[#allocation5 + $0xf] sm:$0x1]  ;;  %v40_v6 = vld [vmem:[#allocation5 + $0x1f] sm:$0x1]  ;;  %vm143_vm13 = vcmp.gt.s32.totalorder %v2987_v2, 0 }
  0x1e   :  { %v41_v7 = vld [vmem:[#allocation5 + $0x2f] sm:$0x1]  ;;  %v42_v8 = vld [vmem:[#allocation5 + $0x3f] sm:$0x1]  ;;  %v80_v17 = vrot.slane %v40_v6, 7  ;;  %s2866_s1 = sshll.u32 %s2960_s0, 4  ;;  %s2867_s1 = int_to_ptr.vmem [resolvable:$true] %s2866_s1 }
  0x1f   :  { %v2990_v3 = vadd.s32 8, %v2985_v1  ;;  %v2993_v4 = vsub.s32 0, %v2985_v1  ;;  %v43_v9 = vld [vmem:[#allocation5 + $0x4f] sm:$0x1]  ;;  %v44_v10 = vld [vmem:[#allocation5 + $0x5f] sm:$0x1]  ;;  %p2933_p11 = scmp.lt.s32.totalorder %s2867_s1, %s2867_s1 }
  0x20   :  { %v45_v11 = vld [vmem:[#allocation5 + $0x6f] sm:$0x1]  ;;  %v46_v12 = vld [vmem:[#allocation5 + $0x7f] sm:$0x1]  ;;  %v83_v18 = vrot.slane %v41_v7, 6  ;;  %v86_v22 = vrot.slane %v42_v8, 5  ;;  %v82_v25 = vsel %vm81_vm0, %v80_v17, %v39_v5 }
  0x21   :  { %v48_v13 = vld [vmem:[#allocation5 + $0x9f] sm:$0x1]  ;;  %v49_v14 = vld [vmem:[#allocation5 + $0xaf] sm:$0x1]  ;;  %v61_v21 = vrot.slane %v2987_v2, %v2993_v4  ;;  %v89_v23 = vrot.slane %v43_v9, 4  ;;  %v92_v26 = vrot.slane %v44_v10, 3 }
  0x22   :  { %v50_v15 = vld [vmem:[#allocation5 + $0xbf] sm:$0x1]  ;;  %v51_v16 = vld [vmem:[#allocation5 + $0xcf] sm:$0x1]  ;;  %v101_v27 = vrot.slane %v48_v13, 7  ;;  %v103_v28 = vrot.slane %v49_v14, 6  ;;  %v85_v30 = vsel %vm84_vm1, %v83_v18, %v82_v25 }
  0x23   :  { %v47_v19 = vld [vmem:[#allocation5 + $0x8f] sm:$0x1]  ;;  %v52_v20 = vld [vmem:[#allocation5 + $0xdf] sm:$0x1]  ;;  %v95_v31 = vrot.slane %v45_v11, 2  ;;  %v105_v32 = vrot.slane %v50_v15, 5  ;;  %v88_v34 = vsel %vm87_vm2, %v86_v22, %v85_v30  ;;  %vm62_vm7 = vcmp.lt.s32.totalorder %v2985_v1, %v61_v21 }
  0x24   :  { %v53_v24 = vld [vmem:[#allocation5 + $0xef] sm:$0x1]  ;;  %v54_v29 = vld [vmem:[#allocation5 + $0xff] sm:$0x1]  ;;  %v107_v33 = vrot.slane %v51_v16, 4  ;;  %v98_v35 = vrot.slane %v46_v12, 1  ;;  %v102_v36 = vsel %vm81_vm0, %v101_v27, %v47_v19  ;;  %v91_v38 = vsel %vm90_vm3, %v89_v23, %v88_v34 }
  0x25   :  { %v109_v37 = vrot.slane %v52_v20, 3  ;;  %v104_v39 = vsel %vm84_vm1, %v103_v28, %v102_v36  ;;  %v111_v40 = vrot.slane %v53_v24, 2  ;;  %v94_v41 = vsel %vm93_vm4, %v92_v26, %v91_v38  ;;  %v3111_v14 = vld [vmem:[#allocation5 + $0x28] sm:$0xff]  ;;  %s2928_s22 = scalar_lea.vmem %s2867_s1, 2048 }
  0x26   :  { %v106_v42 = vsel %vm87_vm2, %v105_v32, %v104_v39  ;;  %v113_v43 = vrot.slane %v54_v29, 1  ;;  %v97_v44 = vsel %vm96_vm5, %v95_v31, %v94_v41  ;;  %vm63_vm8 = vcmp.lt.s32.totalorder %v2990_v3, %v61_v21  ;;  %p2929_p10 = scmp.ne.s32.totalorder %s2867_s1, %s2928_s22  ;;  %p2934_p12 = scmp.lt.s32.totalorder %s2928_s22, %s2928_s22 }
  0x27   :  { %v108_v45 = vsel %vm90_vm3, %v107_v33, %v106_v42  ;;  %v100_v46 = vsel %vm99_vm6, %v98_v35, %v97_v44  ;;  %v2958_v5 = vmov 0   ;;  %v2959_v8 = vmov 1966171168  }
  0x28   :  { %v110_v47 = vsel %vm93_vm4, %v109_v37, %v108_v45  ;;  %v117_v49 = vsel %vm62_vm7, %v100_v46, -inf  ;;  %v144_v6 = vsel %vm143_vm13, 1, %v2958_v5  ;;  %v188_v9 = vunpack.c.l.s4 %v2959_v8  ;;  %p2935_p13 = por %p2934_p12, %p2933_p11 }
  0x29   :  { %v112_v48 = vsel %vm96_vm5, %v111_v40, %v110_v47  ;;  %v148_v11 = vrot.slane %v144_v6, %v2993_v4 }
  0x2a   :  { %v114_v50 = vsel %vm99_vm6, %v113_v43, %v112_v48  ;;  %v189_v13 = vunpack.c.0.s8 %v188_v9  ;;  %p2936_p0 = pnand %p2935_p13, %p2929_p10 }
  0x2b   :  { %v118_v51 = vsel %vm63_vm8, %v114_v50, -inf  ;;  %vm149_vm1 = vcmp.eq.s32.totalorder %v148_v11, 1 }
  0x2c   :  { %v119_v52 = vmax.f32 %v117_v49, %v118_v51  ;;  %v3022_v15 = vsub.s32 %v189_v13, %v2985_v1  ;;  %v3109_v13 = vld [vmem:[#allocation5 + $0x20] sm:$0xff] }
  0x2d   :  { %5524 = vst [vmem:[#allocation15_spill] sm:$0xff] %v3109_v13 }
  0x2e   :  { %v120_v53 = vrot.slane %v119_v52, 4 }
  0x30   :  { %v121_v54 = vmax.f32 %v119_v52, %v120_v53 }
  0x32   :  { %v122_v55 = vrot.slane %v121_v54, 2 }
  0x34   :  { %v123_v56 = vmax.f32 %v121_v54, %v122_v55 }
  0x36   :  { %v124_v57 = vrot.slane %v123_v56, 1 }
  0x38   :  { %v125_v58 = vmax.f32 %v123_v56, %v124_v57  ;;  %v3206_v56 = vld [vmem:[#allocation5 + $0x60] sm:$0xff] }
  0x3a   :  { %vm126_vm9 = vcmp.eq.f32.partialorder %v117_v49, %v125_v58  ;;  %vm127_vm10 = vcmp.eq.f32.partialorder %v118_v51, %v125_v58  ;;  %v3071_v58 = vld [vmem:[#allocation5] sm:$0xff] }
  0x3b   :  { %v128_v59 = vsel %vm126_vm9, %v2985_v1, 16  ;;  %v129_v60 = vsel %vm127_vm10, %v2990_v3, 16  ;;  %5510 = vst [vmem:[#allocation11_spill] sm:$0xff] %v3071_v58 }
  0x3c   :  { %vm130_vm11 = vcmp.lt.s32.totalorder %v128_v59, %v129_v60 }
  0x3d   :  { %v131_v61 = vsel %vm130_vm11, %v128_v59, %v129_v60 }
  0x3e   :  { %v132_v62 = vrot.slane %v131_v61, 4 }
  0x40   :  { %vm133_vm12 = vcmp.lt.s32.totalorder %v131_v61, %v132_v62 }
  0x41   :  { %v134_v63 = vsel %vm133_vm12, %v131_v61, %v132_v62  ;;  %v3078_v61 = vld [vmem:[#allocation5 + $0x8] sm:$0xff]  ;;  %v3080_v62 = vld [vmem:[#allocation5 + $0x10] sm:$0xff] }
  0x42   :  { %v135_v0 = vrot.slane %v134_v63, 2  ;;  %5513 = vst [vmem:[#allocation12_spill] sm:$0xff] %v3078_v61  ;;  %5514 = vst [vmem:[#allocation13_spill] sm:$0xff] %v3080_v62 }
  0x44   :  { %vm136_vm14 = vcmp.lt.s32.totalorder %v134_v63, %v135_v0 }
  0x45   :  { %v137_v7 = vsel %vm136_vm14, %v134_v63, %v135_v0  ;;  %v3082_v63 = vld [vmem:[#allocation5 + $0x18] sm:$0xff] }
  0x46   :  { %v138_v10 = vrot.slane %v137_v7, 1  ;;  %5515 = vst [vmem:[#allocation14_spill] sm:$0xff] %v3082_v63 }
  0x48   :  { %vm139_vm15 = vcmp.lt.s32.totalorder %v137_v7, %v138_v10 }
  0x49   :  { %v140_v12 = vsel %vm139_vm15, %v137_v7, %v138_v10 }
  0x4a   :  { %vm141_vm0 = vcmp.eq.s32.totalorder %v2985_v1, %v140_v12  ;;  %vm142_vm3 = vcmp.eq.s32.totalorder %v2990_v3, %v140_v12 }
  0x4b   :  { %vm3017_vm2 = vmand %vm141_vm0, %vm149_vm1 }
  0x4c   :  { %v184_v16 = vsel %vm3017_vm2, 1, %v2958_v5  ;;  %vm151_vm4 = vmand %vm142_vm3, %vm149_vm1  ;;  %v3037_v29 = vsel %vm3017_vm2, -inf, %v117_v49 }
  0x4d   :  { %v193_v17 = vrot.slane %v184_v16, %v3022_v15  ;;  %v186_v18 = vcombine.high %v184_v16, %v184_v16  ;;  %v185_v19 = vsel %vm151_vm4, 1, %v2958_v5  ;;  %v3039_v30 = vsel %vm151_vm4, -inf, %v118_v51 }
  0x4e   :  { %v235_v21 = vcombine.high %v185_v19, %v185_v19  ;;  %v242_v24 = vrot.slane %v185_v19, %v3022_v15  ;;  %v3044_v35 = vmax.f32 %v3037_v29, %v3039_v30 }
  0x4f   :  { %v201_v20 = vcombine.high %v193_v17, %v193_v17  ;;  %v200_v22 = vrot.slane %v186_v18, %v3022_v15  ;;  %v209_v23 = vrot.slane %v193_v17, %v3022_v15 }
  0x50   :  { %v249_v26 = vrot.slane %v235_v21, %v3022_v15  ;;  %v250_v31 = vcombine.high %v242_v24, %v242_v24  ;;  %v258_v37 = vrot.slane %v242_v24, %v3022_v15  ;;  %v463_v49 = vrot.slane %v3044_v35, 4  ;;  %v3136_v24 = vld [vmem:[#allocation5 + $0x30] sm:$0xff] }
  0x51   :  { %v223_v25 = vrot.slane %v201_v20, %v3022_v15  ;;  %v202_v27 = vcombine.high %v200_v22, %v200_v22  ;;  %v231_v28 = vcombine.high %v209_v23, %v209_v23  ;;  %vm284_vm5 = vcmp.ne.s32.totalorder %v209_v23, 0 }
  0x52   :  { %v251_v33 = vcombine.high %v249_v26, %v249_v26  ;;  %v216_v34 = vrot.slane %v200_v22, %v3022_v15  ;;  %v265_v38 = vrot.slane %v249_v26, %v3022_v15  ;;  %v272_v40 = vrot.slane %v250_v31, %v3022_v15  ;;  %v3248_v31 = vld [vmem:[#allocation5 + $0x88] sm:$0xff] }
  0x53   :  { %v233_v32 = vcombine.high %v223_v25, %v223_v25  ;;  %vm285_vm6 = vcmp.ne.s32.totalorder %v223_v25, 0  ;;  %v230_v36 = vrot.slane %v202_v27, %v3022_v15  ;;  %vm286_vm7 = vcmp.ne.s32.totalorder %v231_v28, 0  ;;  %v3138_v25 = vld [vmem:[#allocation5 + $0x38] sm:$0xff] }
  0x54   :  { %v232_v39 = vcombine.high %v216_v34, %v216_v34  ;;  %v300_v41 = vsel %vm284_vm5, 1, %v2958_v5  ;;  %v301_v42 = vsel %vm285_vm6, 1, %v2958_v5  ;;  %v279_v44 = vrot.slane %v251_v33, %v3022_v15 }
  0x55   :  { %v234_v43 = vcombine.high %v230_v36, %v230_v36  ;;  %v280_v45 = vcombine.high %v258_v37, %v258_v37  ;;  %vm287_vm8 = vcmp.ne.s32.totalorder %v233_v32, 0  ;;  %v281_v46 = vcombine.high %v265_v38, %v265_v38 }
  0x56   :  { %v282_v47 = vcombine.high %v272_v40, %v272_v40  ;;  %v302_v48 = vsel %vm286_vm7, 1, %v2958_v5  ;;  %v283_v50 = vcombine.high %v279_v44, %v279_v44  ;;  %vm288_vm9 = vcmp.ne.s32.totalorder %v216_v34, 0 }
  0x57   :  { %v319_v51 = vrot.slane %v300_v41, %v2993_v4  ;;  %v323_v52 = vrot.slane %v301_v42, %v2993_v4  ;;  %vm289_vm10 = vcmp.ne.s32.totalorder %v230_v36, 0  ;;  %vm3057_vm11 = vcmp.ne.s32.totalorder %v232_v39, 0  ;;  %v3168_v39 = vld [vmem:[#allocation5 + $0x48] sm:$0xff] }
  0x58   :  { %vm292_vm12 = vcmp.ne.s32.totalorder %v258_v37, 0  ;;  %v303_v54 = vsel %vm287_vm8, 1, %v2958_v5  ;;  %vm3062_vm13 = vcmp.ne.s32.totalorder %v234_v43, 0  ;;  %vm293_vm14 = vcmp.ne.s32.totalorder %v272_v40, 0  ;;  %v3166_v37 = vld [vmem:[#allocation5 + $0x40] sm:$0xff] }
  0x59   :  { %vm3066_vm15 = vcmp.ne.s32.totalorder %v280_v45, 0  ;;  %v327_v57 = vrot.slane %v302_v48, %v2993_v4  ;;  %vm3073_vm0 = vcmp.ne.s32.totalorder %v282_v47, 0  ;;  %vm296_vm1 = vcmp.ne.s32.totalorder %v265_v38, 0  ;;  %v3186_v48 = vld [vmem:[#allocation5 + $0x50] sm:$0xff] }
  0x5a   :  { %vm297_vm2 = vcmp.ne.s32.totalorder %v279_v44, 0  ;;  %v304_v60 = vsel %vm288_vm9, 1, %v2958_v5  ;;  %vm3084_vm3 = vcmp.ne.s32.totalorder %v281_v46, 0  ;;  %v331_v6 = vrot.slane %v303_v54, %v2993_v4 }
  0x5b   :  { %vm3089_vm4 = vcmp.eq.s32.totalorder %v319_v51, 1  ;;  %vm3093_vm5 = vcmp.eq.s32.totalorder %v323_v52, 1  ;;  %vm3097_vm6 = vcmp.ne.s32.totalorder %v283_v50, 0  ;;  %v305_v10 = vsel %vm289_vm10, 1, %v2958_v5  ;;  %v3188_v50 = vld [vmem:[#allocation5 + $0x58] sm:$0xff] }
  0x5c   :  { %v306_v11 = vsel %vm3057_vm11, 1, %v2958_v5  ;;  %v307_v12 = vsel %vm3062_vm13, 1, %v2958_v5  ;;  %v308_v16 = vsel %vm292_vm12, 1, %v2958_v5  ;;  %v3117_v17 = vsel %vm293_vm14, 1, %v2958_v5 }
  0x5d   :  { %v335_v18 = vrot.slane %v304_v60, %v2993_v4  ;;  %vm3120_vm7 = vcmp.eq.s32.totalorder %v327_v57, 1  ;;  %v396_v20 = vsel %vm3089_vm4, %v3071_v58, 0.0  ;;  %v397_v21 = vsel %vm3089_vm4, %v3078_v61, 0.0  ;;  %v3208_v57 = vld [vmem:[#allocation5 + $0x68] sm:$0xff] }
  0x5e   :  { %v398_v22 = vsel %vm3093_vm5, %v3080_v62, 0.0  ;;  %v399_v23 = vsel %vm3093_vm5, %v3082_v63, 0.0  ;;  %v3143_v26 = vsel %vm3066_vm15, 1, %v2958_v5  ;;  %v3148_v27 = vsel %vm3073_vm0, 1, %v2958_v5 }
  0x5f   :  { %v339_v28 = vrot.slane %v305_v10, %v2993_v4  ;;  %vm3151_vm8 = vcmp.eq.s32.totalorder %v331_v6, 1  ;;  %v3157_v32 = vsel %vm296_vm1, 1, %v2958_v5  ;;  %v343_v33 = vrot.slane %v306_v11, %v2993_v4 }
  0x60   :  { %v400_v34 = vsel %vm3120_vm7, %v3109_v13, 0.0  ;;  %v401_v36 = vsel %vm3120_vm7, %v3111_v14, 0.0  ;;  %vm3170_vm9 = vcmp.eq.s32.totalorder %v335_v18, 1  ;;  %v428_v38 = vadd.f32 %v398_v22, %v396_v20 }
  0x61   :  { %v443_v41 = vadd.f32 %v399_v23, %v397_v21  ;;  %v464_v42 = vmax.f32 %v3044_v35, %v463_v49  ;;  %v3177_v43 = vsel %vm297_vm2, 1, %v2958_v5  ;;  %v347_v45 = vrot.slane %v307_v12, %v2993_v4  ;;  %v3228_v12 = vld [vmem:[#allocation5 + $0x70] sm:$0xff] }
  0x62   :  { %v402_v46 = vsel %vm3151_vm8, %v3136_v24, 0.0  ;;  %v403_v47 = vsel %vm3151_vm8, %v3138_v25, 0.0  ;;  %vm3190_vm10 = vcmp.eq.s32.totalorder %v339_v28, 1  ;;  %v429_v44 = vadd.f32 %v428_v38, %v400_v34  ;;  %v3246_v28 = vld [vmem:[#allocation5 + $0x80] sm:$0xff] }
  0x63   :  { %v444_v49 = vadd.f32 %v443_v41, %v401_v36  ;;  %v465_v51 = vrot.slane %v464_v42, 2  ;;  %v3197_v52 = vsel %vm3084_vm3, 1, %v2958_v5  ;;  %v351_v53 = vrot.slane %v308_v16, %v2993_v4  ;;  %v3230_v16 = vld [vmem:[#allocation5 + $0x78] sm:$0xff] }
  0x64   :  { %v404_v54 = vsel %vm3170_vm9, %v3166_v37, 0.0  ;;  %v405_v55 = vsel %vm3170_vm9, %v3168_v39, 0.0  ;;  %vm3210_vm11 = vcmp.eq.s32.totalorder %v343_v33, 1  ;;  %v430_v60 = vadd.f32 %v429_v44, %v402_v46  ;;  %v3317_v33 = vld [vmem:[#allocation5 + $0xc8] sm:$0xff] }
  0x65   :  { %v445_v0 = vadd.f32 %v444_v49, %v403_v47  ;;  %v466_v6 = vmax.f32 %v464_v42, %v465_v51  ;;  %vm486_vm12 = vcmp.gt.s32.totalorder %v2987_v2, 1  ;;  %v3218_v7 = vsel %vm3097_vm6, 1, %v2958_v5  ;;  %v3266_v42 = vld [vmem:[#allocation5 + $0x90] sm:$0xff]  ;;  %v3280_v51 = vld [vmem:[#allocation5 + $0xa0] sm:$0xff] }
  0x66   :  { %v355_v8 = vrot.slane %v3117_v17, %v2993_v4  ;;  %v406_v10 = vsel %vm3190_vm10, %v3186_v48, 0.0  ;;  %v407_v11 = vsel %vm3190_vm10, %v3188_v50, 0.0  ;;  %vm3232_vm13 = vcmp.eq.s32.totalorder %v347_v45, 1  ;;  %v3268_v45 = vld [vmem:[#allocation5 + $0x98] sm:$0xff] }
  0x67   :  { %v431_v9 = vadd.f32 %v430_v60, %v404_v54  ;;  %v446_v19 = vadd.f32 %v445_v0, %v405_v55  ;;  %v467_v20 = vrot.slane %v466_v6, 1  ;;  %v359_v17 = vrot.slane %v3143_v26, %v2993_v4  ;;  %v3345_v54 = vld [vmem:[#allocation5 + $0xe0] sm:$0xff] }
  0x68   :  { %v363_v21 = vrot.slane %v3148_v27, %v2993_v4  ;;  %v408_v22 = vsel %vm3210_vm11, %v3206_v56, 0.0  ;;  %v409_v23 = vsel %vm3210_vm11, %v3208_v57, 0.0  ;;  %vm3250_vm14 = vcmp.eq.s32.totalorder %v351_v53, 1  ;;  %v3282_v53 = vld [vmem:[#allocation5 + $0xa8] sm:$0xff] }
  0x69   :  { %v432_v26 = vadd.f32 %v431_v9, %v406_v10  ;;  %v447_v34 = vadd.f32 %v446_v19, %v407_v11  ;;  %v468_v36 = vmax.f32 %v466_v6, %v467_v20  ;;  %v367_v27 = vrot.slane %v3157_v32, %v2993_v4  ;;  %v3296_v10 = vld [vmem:[#allocation5 + $0xb0] sm:$0xff]  ;;  %v3298_v11 = vld [vmem:[#allocation5 + $0xb8] sm:$0xff] }
  0x6a   :  { %vm3256_vm15 = vcmp.eq.s32.totalorder %v355_v8, 1  ;;  %v410_v38 = vsel %vm3232_vm13, %v3228_v12, 0.0  ;;  %v411_v41 = vsel %vm3232_vm13, %v3230_v16, 0.0  ;;  %v412_v32 = vsel %vm3250_vm14, %v3246_v28, 0.0 }
  0x6b   :  { %v433_v46 = vadd.f32 %v432_v26, %v408_v22  ;;  %v448_v47 = vadd.f32 %v447_v34, %v409_v23  ;;  %vm469_vm0 = vcmp.eq.f32.partialorder %v3037_v29, %v468_v36  ;;  %vm470_vm1 = vcmp.eq.f32.partialorder %v3039_v30, %v468_v36  ;;  %v3315_v23 = vld [vmem:[#allocation5 + $0xc0] sm:$0xff] }
  0x6c   :  { %v413_v35 = vsel %vm3250_vm14, %v3248_v31, 0.0  ;;  %v471_v44 = vsel %vm469_vm0, %v2985_v1, 16  ;;  %v472_v49 = vsel %vm470_vm1, %v2990_v3, 16  ;;  %vm3284_vm2 = vcmp.eq.s32.totalorder %v359_v17, 1 }
  0x6d   :  { %v434_v55 = vadd.f32 %v433_v46, %v410_v38  ;;  %v449_v59 = vadd.f32 %v448_v47, %v411_v41  ;;  %vm473_vm3 = vcmp.lt.s32.totalorder %v471_v44, %v472_v49  ;;  %v371_v60 = vrot.slane %v3177_v43, %v2993_v4  ;;  %v3331_v46 = vld [vmem:[#allocation5 + $0xd0] sm:$0xff] }
  0x6e   :  { %v414_v0 = vsel %vm3256_vm15, %v3266_v42, 0.0  ;;  %v415_v6 = vsel %vm3256_vm15, %v3268_v45, 0.0  ;;  %v474_v8 = vsel %vm473_vm3, %v471_v44, %v472_v49  ;;  %vm3300_vm4 = vcmp.eq.s32.totalorder %v363_v21, 1 }
  0x6f   :  { %v435_v9 = vadd.f32 %v434_v55, %v412_v32  ;;  %v450_v19 = vadd.f32 %v449_v59, %v413_v35  ;;  %v475_v43 = vrot.slane %v474_v8, 4  ;;  %v375_v20 = vrot.slane %v3197_v52, %v2993_v4  ;;  %v3347_v55 = vld [vmem:[#allocation5 + $0xe8] sm:$0xff] }
  0x70   :  { %v416_v17 = vsel %vm3284_vm2, %v3280_v51, 0.0  ;;  %v417_v22 = vsel %vm3284_vm2, %v3282_v53, 0.0  ;;  %v487_v21 = vsel %vm486_vm12, 1, %v2958_v5  ;;  %vm3319_vm5 = vcmp.eq.s32.totalorder %v367_v27, 1  ;;  %v3333_v27 = vld [vmem:[#allocation5 + $0xd8] sm:$0xff] }
  0x71   :  { %v436_v52 = vadd.f32 %v435_v9, %v414_v0  ;;  %v451_v34 = vadd.f32 %v450_v19, %v415_v6  ;;  %vm476_vm6 = vcmp.lt.s32.totalorder %v474_v8, %v475_v43  ;;  %v379_v36 = vrot.slane %v3218_v7, %v2993_v4  ;;  %v3360_v19 = vld [vmem:[#allocation5 + $0xf0] sm:$0xff] }
  0x72   :  { %v418_v40 = vsel %vm3300_vm4, %v3296_v10, 0.0  ;;  %v419_v38 = vsel %vm3300_vm4, %v3298_v11, 0.0  ;;  %v477_v41 = vsel %vm476_vm6, %v474_v8, %v475_v43  ;;  %vm3335_vm7 = vcmp.eq.s32.totalorder %v371_v60, 1  ;;  %v3362_v43 = vld [vmem:[#allocation5 + $0xf8] sm:$0xff] }
  0x73   :  { %v437_v32 = vadd.f32 %v436_v52, %v416_v17  ;;  %v452_v35 = vadd.f32 %v451_v34, %v417_v22  ;;  %v478_v7 = vrot.slane %v477_v41, 2  ;;  %v420_v44 = vsel %vm3319_vm5, %v3315_v23, 0.0 }
  0x74   :  { %v421_v49 = vsel %vm3319_vm5, %v3317_v33, 0.0  ;;  %vm3349_vm8 = vcmp.eq.s32.totalorder %v375_v20, 1  ;;  %v422_v6 = vsel %vm3335_vm7, %v3331_v46, 0.0  ;;  %v423_v8 = vsel %vm3335_vm7, %v3333_v27, 0.0 }
  0x75   :  { %v438_v60 = vadd.f32 %v437_v32, %v418_v40  ;;  %v453_v0 = vadd.f32 %v452_v35, %v419_v38  ;;  %vm479_vm9 = vcmp.lt.s32.totalorder %v477_v41, %v478_v7  ;;  %v491_v9 = vrot.slane %v487_v21, %v2993_v4 }
  0x76   :  { %v480_v18 = vsel %vm479_vm9, %v477_v41, %v478_v7  ;;  %vm3364_vm10 = vcmp.eq.s32.totalorder %v379_v36, 1  ;;  %v424_v52 = vsel %vm3349_vm8, %v3345_v54, 0.0  ;;  %v425_v34 = vsel %vm3349_vm8, %v3347_v55, 0.0 }
  0x77   :  { %v439_v17 = vadd.f32 %v438_v60, %v420_v44  ;;  %v454_v22 = vadd.f32 %v453_v0, %v421_v49  ;;  %v481_v26 = vrot.slane %v480_v18, 1  ;;  %v426_v36 = vsel %vm3364_vm10, %v3360_v19, 0.0 }
  0x78   :  { %v427_v38 = vsel %vm3364_vm10, %v3362_v43, 0.0  ;;  %vm492_vm13 = vcmp.eq.s32.totalorder %v491_v9, 1 }
  0x79   :  { %v440_v21 = vadd.f32 %v439_v17, %v422_v6  ;;  %v455_v40 = vadd.f32 %v454_v22, %v423_v8  ;;  %vm482_vm11 = vcmp.lt.s32.totalorder %v480_v18, %v481_v26 }
  0x7a   :  { %v483_v41 = vsel %vm482_vm11, %v480_v18, %v481_v26 }
  0x7b   :  { %v441_v47 = vadd.f32 %v440_v21, %v424_v52  ;;  %v456_v32 = vadd.f32 %v455_v40, %v425_v34  ;;  %vm484_vm12 = vcmp.eq.s32.totalorder %v2985_v1, %v483_v41  ;;  %vm485_vm15 = vcmp.eq.s32.totalorder %v2990_v3, %v483_v41 }
  0x7c   :  { %vm3381_vm14 = vmand %vm484_vm12, %vm492_vm13 }
  0x7d   :  { %v442_v35 = vadd.f32 %v441_v47, %v426_v36  ;;  %v457_v7 = vadd.f32 %v456_v32, %v427_v38  ;;  %v527_v49 = vsel %vm3381_vm14, 1, %v2958_v5  ;;  %vm494_vm0 = vmand %vm485_vm15, %vm492_vm13  ;;  %v3399_v34 = vsel %vm3381_vm14, -inf, %v3037_v29 }
  0x7e   :  { %v536_v59 = vrot.slane %v527_v49, %v3022_v15  ;;  %v529_v60 = vcombine.high %v527_v49, %v527_v49  ;;  %v528_v0 = vsel %vm494_vm0, 1, %v2958_v5  ;;  %v3402_v21 = vsel %vm494_vm0, -inf, %v3039_v30 }
  0x7f   :  { %458 = vst [vmem:[#allocation7] sm:$0xff] %v442_v35  ;;  %459 = vst [vmem:[#allocation7 + $0x8] sm:$0xff] %v457_v7  ;;  %v578_v8 = vcombine.high %v528_v0, %v528_v0  ;;  %v585_v20 = vrot.slane %v528_v0, %v3022_v15  ;;  %v805_v47 = vmax.f32 %v3399_v34, %v3402_v21 }
  0x80   :  { %v544_v6 = vcombine.high %v536_v59, %v536_v59  ;;  %v543_v18 = vrot.slane %v529_v60, %v3022_v15  ;;  %v552_v9 = vrot.slane %v536_v59, %v3022_v15 }
  0x81   :  { %v592_v22 = vrot.slane %v578_v8, %v3022_v15  ;;  %v593_v40 = vcombine.high %v585_v20, %v585_v20  ;;  %v601_v35 = vrot.slane %v585_v20, %v3022_v15 }
  0x82   :  { %v566_v17 = vrot.slane %v544_v6, %v3022_v15  ;;  %v545_v26 = vcombine.high %v543_v18, %v543_v18  ;;  %v574_v52 = vcombine.high %v552_v9, %v552_v9  ;;  %vm627_vm1 = vcmp.ne.s32.totalorder %v552_v9, 0 }
  0x83   :  { %v594_v38 = vcombine.high %v592_v22, %v592_v22  ;;  %v559_v41 = vrot.slane %v543_v18, %v3022_v15  ;;  %v608_v29 = vrot.slane %v592_v22, %v3022_v15  ;;  %v615_v30 = vrot.slane %v593_v40, %v3022_v15 }
  0x84   :  { %v576_v36 = vcombine.high %v566_v17, %v566_v17  ;;  %vm628_vm2 = vcmp.ne.s32.totalorder %v566_v17, 0  ;;  %v573_v32 = vrot.slane %v545_v26, %v3022_v15  ;;  %vm629_vm3 = vcmp.ne.s32.totalorder %v574_v52, 0 }
  0x85   :  { %v575_v7 = vcombine.high %v559_v41, %v559_v41  ;;  %v643_v44 = vsel %vm627_vm1, 1, %v2958_v5  ;;  %v644_v49 = vsel %vm628_vm2, 1, %v2958_v5  ;;  %v622_v60 = vrot.slane %v594_v38, %v3022_v15 }
  0x86   :  { %v577_v59 = vcombine.high %v573_v32, %v573_v32  ;;  %v623_v0 = vcombine.high %v601_v35, %v601_v35  ;;  %vm630_vm4 = vcmp.ne.s32.totalorder %v576_v36, 0  ;;  %v624_v6 = vcombine.high %v608_v29, %v608_v29 }
  0x87   :  { %v625_v8 = vcombine.high %v615_v30, %v615_v30  ;;  %v645_v18 = vsel %vm629_vm3, 1, %v2958_v5  ;;  %v806_v9 = vrot.slane %v805_v47, 4  ;;  %v626_v20 = vcombine.high %v622_v60, %v622_v60 }
  0x88   :  { %vm631_vm5 = vcmp.ne.s32.totalorder %v559_v41, 0  ;;  %v662_v17 = vrot.slane %v643_v44, %v2993_v4  ;;  %v666_v22 = vrot.slane %v644_v49, %v2993_v4  ;;  %vm632_vm6 = vcmp.ne.s32.totalorder %v573_v32, 0 }
  0x89   :  { %vm3417_vm7 = vcmp.ne.s32.totalorder %v575_v7, 0  ;;  %vm635_vm8 = vcmp.ne.s32.totalorder %v601_v35, 0  ;;  %v646_v52 = vsel %vm630_vm4, 1, %v2958_v5  ;;  %vm634_vm9 = vcmp.ne.s32.totalorder %v577_v59, 0 }
  0x8a   :  { %vm636_vm10 = vcmp.ne.s32.totalorder %v615_v30, 0  ;;  %vm3422_vm11 = vcmp.ne.s32.totalorder %v623_v0, 0  ;;  %v670_v36 = vrot.slane %v645_v18, %v2993_v4  ;;  %vm3427_vm12 = vcmp.ne.s32.totalorder %v625_v8, 0 }
  0x8b   :  { %vm639_vm13 = vcmp.ne.s32.totalorder %v608_v29, 0  ;;  %vm640_vm14 = vcmp.ne.s32.totalorder %v622_v60, 0  ;;  %v647_v41 = vsel %vm631_vm5, 1, %v2958_v5  ;;  %vm3432_vm15 = vcmp.ne.s32.totalorder %v624_v6, 0 }
  0x8c   :  { %v674_v44 = vrot.slane %v646_v52, %v2993_v4  ;;  %vm3437_vm0 = vcmp.eq.s32.totalorder %v662_v17, 1  ;;  %vm3441_vm1 = vcmp.eq.s32.totalorder %v666_v22, 1  ;;  %vm3445_vm2 = vcmp.ne.s32.totalorder %v626_v20, 0 }
  0x8d   :  { %v648_v6 = vsel %vm632_vm6, 1, %v2958_v5  ;;  %v649_v8 = vsel %vm3417_vm7, 1, %v2958_v5  ;;  %v650_v18 = vsel %vm634_vm9, 1, %v2958_v5  ;;  %v651_v17 = vsel %vm635_vm8, 1, %v2958_v5 }
  0x8e   :  { %v652_v22 = vsel %vm636_vm10, 1, %v2958_v5  ;;  %v678_v20 = vrot.slane %v647_v41, %v2993_v4  ;;  %vm3460_vm3 = vcmp.eq.s32.totalorder %v670_v36, 1  ;;  %v739_v32 = vsel %vm3437_vm0, %v3071_v58, 0.0 }
  0x8f   :  { %v740_v26 = vsel %vm3437_vm0, %v3078_v61, 0.0  ;;  %v741_v35 = vsel %vm3441_vm1, %v3080_v62, 0.0  ;;  %v742_v30 = vsel %vm3441_vm1, %v3082_v63, 0.0  ;;  %v653_v36 = vsel %vm3422_vm11, 1, %v2958_v5 }
  0x90   :  { %v3482_v41 = vsel %vm3427_vm12, 1, %v2958_v5  ;;  %v682_v49 = vrot.slane %v648_v6, %v2993_v4  ;;  %vm3485_vm4 = vcmp.eq.s32.totalorder %v674_v44, 1  ;;  %v3491_v62 = vsel %vm639_vm13, 1, %v2958_v5 }
  0x91   :  { %v686_v59 = vrot.slane %v649_v8, %v2993_v4  ;;  %v743_v40 = vsel %vm3460_vm3, %v3109_v13, 0.0  ;;  %v744_v38 = vsel %vm3460_vm3, %v3111_v14, 0.0  ;;  %vm3500_vm5 = vcmp.eq.s32.totalorder %v678_v20, 1 }
  0x92   :  { %v771_v44 = vadd.f32 %v741_v35, %v739_v32  ;;  %v786_v63 = vadd.f32 %v742_v30, %v740_v26  ;;  %v807_v58 = vmax.f32 %v805_v47, %v806_v9  ;;  %v3506_v29 = vsel %vm640_vm14, 1, %v2958_v5 }
  0x93   :  { %v690_v8 = vrot.slane %v650_v18, %v2993_v4  ;;  %v745_v13 = vsel %vm3485_vm4, %v3136_v24, 0.0  ;;  %v746_v20 = vsel %vm3485_vm4, %v3138_v25, 0.0  ;;  %vm3515_vm6 = vcmp.eq.s32.totalorder %v682_v49, 1 }
  0x94   :  { %v772_v32 = vadd.f32 %v771_v44, %v743_v40  ;;  %v787_v47 = vadd.f32 %v786_v63, %v744_v38  ;;  %v808_v9 = vrot.slane %v807_v58, 2  ;;  %v3522_v60 = vsel %vm3432_vm15, 1, %v2958_v5 }
  0x95   :  { %v694_v18 = vrot.slane %v651_v17, %v2993_v4  ;;  %v747_v26 = vsel %vm3500_vm5, %v3166_v37, 0.0  ;;  %v748_v61 = vsel %vm3500_vm5, %v3168_v39, 0.0  ;;  %vm3531_vm7 = vcmp.eq.s32.totalorder %v686_v59, 1 }
  0x96   :  { %v773_v63 = vadd.f32 %v772_v32, %v745_v13  ;;  %v788_v30 = vadd.f32 %v787_v47, %v746_v20  ;;  %v809_v49 = vmax.f32 %v807_v58, %v808_v9  ;;  %vm829_vm8 = vcmp.gt.s32.totalorder %v2987_v2, 2 }
  0x97   :  { %v3539_v7 = vsel %vm3445_vm2, 1, %v2958_v5  ;;  %v698_v17 = vrot.slane %v652_v22, %v2993_v4  ;;  %v749_v40 = vsel %vm3515_vm6, %v3186_v48, 0.0  ;;  %v750_v59 = vsel %vm3515_vm6, %v3188_v50, 0.0 }
  0x98   :  { %vm3548_vm9 = vcmp.eq.s32.totalorder %v690_v8, 1  ;;  %v774_v58 = vadd.f32 %v773_v63, %v747_v26  ;;  %v789_v38 = vadd.f32 %v788_v30, %v748_v61  ;;  %v810_v6 = vrot.slane %v809_v49, 1 }
  0x99   :  { %v702_v0 = vrot.slane %v653_v36, %v2993_v4  ;;  %v706_v22 = vrot.slane %v3482_v41, %v2993_v4  ;;  %v751_v44 = vsel %vm3531_vm7, %v3206_v56, 0.0  ;;  %v752_v20 = vsel %vm3531_vm7, %v3208_v57, 0.0 }
  0x9a   :  { %vm3561_vm10 = vcmp.eq.s32.totalorder %v694_v18, 1  ;;  %v775_v52 = vadd.f32 %v774_v58, %v749_v40  ;;  %v790_v32 = vadd.f32 %v789_v38, %v750_v59  ;;  %v811_v47 = vmax.f32 %v809_v49, %v810_v6 }
  0x9b   :  { %v710_v36 = vrot.slane %v3491_v62, %v2993_v4  ;;  %vm3567_vm11 = vcmp.eq.s32.totalorder %v698_v17, 1  ;;  %v753_v9 = vsel %vm3548_vm9, %v3228_v12, 0.0  ;;  %v754_v18 = vsel %vm3548_vm9, %v3230_v16, 0.0 }
  0x9c   :  { %v776_v26 = vadd.f32 %v775_v52, %v751_v44  ;;  %v791_v61 = vadd.f32 %v790_v32, %v752_v20  ;;  %vm812_vm12 = vcmp.eq.f32.partialorder %v3399_v34, %v811_v47  ;;  %vm813_vm13 = vcmp.eq.f32.partialorder %v3402_v21, %v811_v47 }
  0x9d   :  { %v755_v62 = vsel %vm3561_vm10, %v3246_v28, 0.0  ;;  %v756_v35 = vsel %vm3561_vm10, %v3248_v31, 0.0  ;;  %v814_v63 = vsel %vm812_vm12, %v2985_v1, 16  ;;  %v815_v30 = vsel %vm813_vm13, %v2990_v3, 16 }
  0x9e   :  { %vm3587_vm14 = vcmp.eq.s32.totalorder %v702_v0, 1  ;;  %v777_v17 = vadd.f32 %v776_v26, %v753_v9  ;;  %v792_v40 = vadd.f32 %v791_v61, %v754_v18  ;;  %vm816_vm15 = vcmp.lt.s32.totalorder %v814_v63, %v815_v30 }
  0x9f   :  { %v714_v59 = vrot.slane %v3506_v29, %v2993_v4  ;;  %v757_v13 = vsel %vm3567_vm11, %v3266_v42, 0.0  ;;  %v758_v58 = vsel %vm3567_vm11, %v3268_v45, 0.0  ;;  %v817_v38 = vsel %vm816_vm15, %v814_v63, %v815_v30 }
  0xa0   :  { %vm3599_vm0 = vcmp.eq.s32.totalorder %v706_v22, 1  ;;  %v778_v0 = vadd.f32 %v777_v17, %v755_v62  ;;  %v793_v44 = vadd.f32 %v792_v40, %v756_v35  ;;  %v818_v20 = vrot.slane %v817_v38, 4 }
  0xa1   :  { %v718_v8 = vrot.slane %v3522_v60, %v2993_v4  ;;  %v759_v29 = vsel %vm3587_vm14, %v3280_v51, 0.0  ;;  %v760_v52 = vsel %vm3587_vm14, %v3282_v53, 0.0  ;;  %v830_v22 = vsel %vm829_vm8, 1, %v2958_v5 }
  0xa2   :  { %vm3614_vm1 = vcmp.eq.s32.totalorder %v710_v36, 1  ;;  %v779_v47 = vadd.f32 %v778_v0, %v757_v13  ;;  %v794_v41 = vadd.f32 %v793_v44, %v758_v58  ;;  %vm819_vm2 = vcmp.lt.s32.totalorder %v817_v38, %v818_v20 }
  0xa3   :  { %v722_v60 = vrot.slane %v3539_v7, %v2993_v4  ;;  %v761_v9 = vsel %vm3599_vm0, %v3296_v10, 0.0  ;;  %v762_v18 = vsel %vm3599_vm0, %v3298_v11, 0.0  ;;  %v820_v2 = vsel %vm819_vm2, %v817_v38, %v818_v20 }
  0xa4   :  { %vm3626_vm3 = vcmp.eq.s32.totalorder %v714_v59, 1  ;;  %v780_v26 = vadd.f32 %v779_v47, %v759_v29  ;;  %v795_v61 = vadd.f32 %v794_v41, %v760_v52  ;;  %v821_v62 = vrot.slane %v820_v2, 2 }
  0xa5   :  { %v763_v7 = vsel %vm3614_vm1, %v3315_v23, 0.0  ;;  %v764_v35 = vsel %vm3614_vm1, %v3317_v33, 0.0  ;;  %vm3636_vm4 = vcmp.eq.s32.totalorder %v718_v8, 1  ;;  %v765_v17 = vsel %vm3626_vm3, %v3331_v46, 0.0 }
  0xa6   :  { %v781_v30 = vadd.f32 %v780_v26, %v761_v9  ;;  %v796_v49 = vadd.f32 %v795_v61, %v762_v18  ;;  %vm822_vm5 = vcmp.lt.s32.totalorder %v820_v2, %v821_v62  ;;  %v766_v40 = vsel %vm3626_vm3, %v3333_v27, 0.0 }
  0xa7   :  { %v823_v59 = vsel %vm822_vm5, %v820_v2, %v821_v62  ;;  %v834_v13 = vrot.slane %v830_v22, %v2993_v4  ;;  %vm3647_vm6 = vcmp.eq.s32.totalorder %v722_v60, 1  ;;  %v767_v44 = vsel %vm3636_vm4, %v3345_v54, 0.0 }
  0xa8   :  { %v782_v38 = vadd.f32 %v781_v30, %v763_v7  ;;  %v797_v6 = vadd.f32 %v796_v49, %v764_v35  ;;  %v824_v0 = vrot.slane %v823_v59, 1  ;;  %v768_v20 = vsel %vm3636_vm4, %v3347_v55, 0.0 }
  0xa9   :  { %v769_v52 = vsel %vm3647_vm6, %v3360_v19, 0.0  ;;  %v770_v22 = vsel %vm3647_vm6, %v3362_v43, 0.0  ;;  %vm835_vm9 = vcmp.eq.s32.totalorder %v834_v13, 1 }
  0xaa   :  { %v783_v8 = vadd.f32 %v782_v38, %v765_v17  ;;  %v798_v29 = vadd.f32 %v797_v6, %v766_v40  ;;  %vm825_vm7 = vcmp.lt.s32.totalorder %v823_v59, %v824_v0 }
  0xab   :  { %v826_v32 = vsel %vm825_vm7, %v823_v59, %v824_v0 }
  0xac   :  { %v784_v47 = vadd.f32 %v783_v8, %v767_v44  ;;  %v799_v41 = vadd.f32 %v798_v29, %v768_v20  ;;  %vm827_vm8 = vcmp.eq.s32.totalorder %v2985_v1, %v826_v32  ;;  %vm828_vm11 = vcmp.eq.s32.totalorder %v2990_v3, %v826_v32 }
  0xad   :  { %vm3664_vm10 = vmand %vm827_vm8, %vm835_vm9 }
  0xae   :  { %v785_v60 = vadd.f32 %v784_v47, %v769_v52  ;;  %v800_v9 = vadd.f32 %v799_v41, %v770_v22  ;;  %v870_v2 = vsel %vm3664_vm10, 1, %v2958_v5  ;;  %vm837_vm12 = vmand %vm828_vm11, %vm835_vm9  ;;  %v3682_v13 = vsel %vm3664_vm10, -inf, %v3399_v34 }
  0xaf   :  { %v879_v36 = vrot.slane %v870_v2, %v3022_v15  ;;  %v872_v26 = vcombine.high %v870_v2, %v870_v2  ;;  %v871_v61 = vsel %vm837_vm12, 1, %v2958_v5  ;;  %v3685_v58 = vsel %vm837_vm12, -inf, %v3402_v21 }
  0xb0   :  { %801 = vst [vmem:[#allocation7 + $0x10] sm:$0xff] %v785_v60  ;;  %802 = vst [vmem:[#allocation7 + $0x18] sm:$0xff] %v800_v9  ;;  %v921_v7 = vcombine.high %v871_v61, %v871_v61  ;;  %v928_v30 = vrot.slane %v871_v61, %v3022_v15  ;;  %v1148_v20 = vmax.f32 %v3682_v13, %v3685_v58 }
  0xb1   :  { %v887_v62 = vcombine.high %v879_v36, %v879_v36  ;;  %v886_v35 = vrot.slane %v872_v26, %v3022_v15  ;;  %v895_v63 = vrot.slane %v879_v36, %v3022_v15 }
  0xb2   :  { %v935_v17 = vrot.slane %v921_v7, %v3022_v15  ;;  %v936_v38 = vcombine.high %v928_v30, %v928_v30  ;;  %v944_v29 = vrot.slane %v928_v30, %v3022_v15  ;;  %v1149_v36 = vrot.slane %v1148_v20, 4 }
  0xb3   :  { %v909_v49 = vrot.slane %v887_v62, %v3022_v15  ;;  %v888_v40 = vcombine.high %v886_v35, %v886_v35  ;;  %v917_v59 = vcombine.high %v895_v63, %v895_v63  ;;  %vm970_vm13 = vcmp.ne.s32.totalorder %v895_v63, 0 }
  0xb4   :  { %v937_v0 = vcombine.high %v935_v17, %v935_v17  ;;  %v902_v44 = vrot.slane %v886_v35, %v3022_v15  ;;  %v951_v34 = vrot.slane %v935_v17, %v3022_v15  ;;  %v958_v21 = vrot.slane %v936_v38, %v3022_v15 }
  0xb5   :  { %v919_v6 = vcombine.high %v909_v49, %v909_v49  ;;  %vm971_vm14 = vcmp.ne.s32.totalorder %v909_v49, 0  ;;  %v916_v8 = vrot.slane %v888_v40, %v3022_v15  ;;  %vm972_vm15 = vcmp.ne.s32.totalorder %v917_v59, 0  ;;  %v3818_v40 = vld [vmem:[#allocation2] sm:$0x1] }
  0xb6   :  { %v918_v52 = vcombine.high %v902_v44, %v902_v44  ;;  %v986_v22 = vsel %vm970_vm13, 1, %v2958_v5  ;;  %v987_v32 = vsel %vm971_vm14, 1, %v2958_v5  ;;  %v965_v41 = vrot.slane %v937_v0, %v3022_v15 }
  0xb7   :  { %v920_v47 = vcombine.high %v916_v8, %v916_v8  ;;  %v966_v60 = vcombine.high %v944_v29, %v944_v29  ;;  %vm973_vm0 = vcmp.ne.s32.totalorder %v919_v6, 0  ;;  %v967_v9 = vcombine.high %v951_v34, %v951_v34 }
  0xb8   :  { %v968_v18 = vcombine.high %v958_v21, %v958_v21  ;;  %v988_v2 = vsel %vm972_vm15, 1, %v2958_v5  ;;  %v969_v26 = vcombine.high %v965_v41, %v965_v41  ;;  %vm974_vm1 = vcmp.ne.s32.totalorder %v902_v44, 0 }
  0xb9   :  { %v1005_v61 = vrot.slane %v986_v22, %v2993_v4  ;;  %v1009_v62 = vrot.slane %v987_v32, %v2993_v4  ;;  %vm975_vm2 = vcmp.ne.s32.totalorder %v916_v8, 0  ;;  %vm3700_vm3 = vcmp.ne.s32.totalorder %v918_v52, 0  ;;  %v5615_v8 = vld [vmem:[#allocation11_spill] sm:$0xff] }
  0xba   :  { %vm978_vm4 = vcmp.ne.s32.totalorder %v944_v29, 0  ;;  %v989_v35 = vsel %vm973_vm0, 1, %v2958_v5  ;;  %vm977_vm5 = vcmp.ne.s32.totalorder %v920_v47, 0  ;;  %vm979_vm6 = vcmp.ne.s32.totalorder %v958_v21, 0  ;;  %v5618_v21 = vld [vmem:[#allocation14_spill] sm:$0xff] }
  0xbb   :  { %vm3705_vm7 = vcmp.ne.s32.totalorder %v966_v60, 0  ;;  %v1013_v30 = vrot.slane %v988_v2, %v2993_v4  ;;  %vm3710_vm8 = vcmp.ne.s32.totalorder %v968_v18, 0  ;;  %vm982_vm9 = vcmp.ne.s32.totalorder %v951_v34, 0  ;;  %v5616_v2 = vld [vmem:[#allocation12_spill] sm:$0xff] }
  0xbc   :  { %vm983_vm10 = vcmp.ne.s32.totalorder %v965_v41, 0  ;;  %v990_v17 = vsel %vm974_vm1, 1, %v2958_v5  ;;  %vm3715_vm11 = vcmp.ne.s32.totalorder %v967_v9, 0  ;;  %v1017_v59 = vrot.slane %v989_v35, %v2993_v4 }
  0xbd   :  { %vm3720_vm12 = vcmp.eq.s32.totalorder %v1005_v61, 1  ;;  %vm3724_vm13 = vcmp.eq.s32.totalorder %v1009_v62, 1  ;;  %vm3728_vm14 = vcmp.ne.s32.totalorder %v969_v26, 0  ;;  %v991_v44 = vsel %vm975_vm2, 1, %v2958_v5  ;;  %v5617_v61 = vld [vmem:[#allocation13_spill] sm:$0xff] }
  0xbe   :  { %v992_v52 = vsel %vm3700_vm3, 1, %v2958_v5  ;;  %v993_v22 = vsel %vm977_vm5, 1, %v2958_v5  ;;  %v994_v32 = vsel %vm978_vm4, 1, %v2958_v5  ;;  %v995_v47 = vsel %vm979_vm6, 1, %v2958_v5 }
  0xbf   :  { %v1021_v60 = vrot.slane %v990_v17, %v2993_v4  ;;  %vm3743_vm15 = vcmp.eq.s32.totalorder %v1013_v30, 1  ;;  %v1082_v18 = vsel %vm3720_vm12, %v5615_v8, 0.0  ;;  %v1083_v26 = vsel %vm3720_vm12, %v5616_v2, 0.0  ;;  %v5621_v8 = vld [vmem:[#allocation15_spill] sm:$0xff] }
  0xc0   :  { %v1084_v29 = vsel %vm3724_vm13, %v5617_v61, 0.0  ;;  %v1085_v62 = vsel %vm3724_vm13, %v5618_v21, 0.0  ;;  %v996_v7 = vsel %vm3705_vm7, 1, %v2958_v5  ;;  %v3765_v35 = vsel %vm3710_vm8, 1, %v2958_v5 }
  0xc1   :  { %v1025_v30 = vrot.slane %v991_v44, %v2993_v4  ;;  %vm3768_vm0 = vcmp.eq.s32.totalorder %v1017_v59, 1  ;;  %v3774_v38 = vsel %vm982_vm9, 1, %v2958_v5  ;;  %v1029_v6 = vrot.slane %v992_v52, %v2993_v4 }
  0xc2   :  { %v1086_v63 = vsel %vm3743_vm15, %v5621_v8, 0.0  ;;  %v1087_v49 = vsel %vm3743_vm15, %v3111_v14, 0.0  ;;  %vm3783_vm1 = vcmp.eq.s32.totalorder %v1021_v60, 1  ;;  %v1114_v59 = vadd.f32 %v1084_v29, %v1082_v18 }
  0xc3   :  { %v1129_v2 = vadd.f32 %v1085_v62, %v1083_v26  ;;  %v1150_v61 = vmax.f32 %v1148_v20, %v1149_v36  ;;  %v3789_v34 = vsel %vm983_vm10, 1, %v2958_v5  ;;  %v1033_v52 = vrot.slane %v993_v22, %v2993_v4 }
  0xc4   :  { %v1088_v21 = vsel %vm3768_vm0, %v3136_v24, 0.0  ;;  %v1089_v14 = vsel %vm3768_vm0, %v3138_v25, 0.0  ;;  %vm3798_vm2 = vcmp.eq.s32.totalorder %v1025_v30, 1  ;;  %v1115_v9 = vadd.f32 %v1114_v59, %v1086_v63 }
  0xc5   :  { %v1130_v20 = vadd.f32 %v1129_v2, %v1087_v49  ;;  %v1151_v36 = vrot.slane %v1150_v61, 2  ;;  %v3805_v41 = vsel %vm3715_vm11, 1, %v2958_v5  ;;  %v1037_v22 = vrot.slane %v994_v32, %v2993_v4 }
  0xc6   :  { %v1090_v24 = vsel %vm3783_vm1, %v3166_v37, 0.0  ;;  %v1091_v25 = vsel %vm3783_vm1, %v3168_v39, 0.0  ;;  %vm3814_vm3 = vcmp.eq.s32.totalorder %v1029_v6, 1  ;;  %v1116_v26 = vadd.f32 %v1115_v9, %v1088_v21 }
  0xc7   :  { %v1131_v29 = vadd.f32 %v1130_v20, %v1089_v14  ;;  %v1152_v62 = vmax.f32 %v1150_v61, %v1151_v36  ;;  %vm1172_vm4 = vcmp.gt.s32.totalorder %v3818_v40, 3  ;;  %v3824_v32 = vsel %vm3728_vm14, 1, %v2958_v5 }
  0xc8   :  { %v1041_v37 = vrot.slane %v995_v47, %v2993_v4  ;;  %v1092_v39 = vsel %vm3798_vm2, %v3186_v48, 0.0  ;;  %v1093_v30 = vsel %vm3798_vm2, %v3188_v50, 0.0  ;;  %vm3833_vm5 = vcmp.eq.s32.totalorder %v1033_v52, 1 }
  0xc9   :  { %v1117_v6 = vadd.f32 %v1116_v26, %v1090_v24  ;;  %v1132_v8 = vadd.f32 %v1131_v29, %v1091_v25  ;;  %v1153_v63 = vrot.slane %v1152_v62, 1  ;;  %v1045_v0 = vrot.slane %v996_v7, %v2993_v4 }
  0xca   :  { %v1049_v47 = vrot.slane %v3765_v35, %v2993_v4  ;;  %v1094_v48 = vsel %vm3814_vm3, %v3206_v56, 0.0  ;;  %v1095_v50 = vsel %vm3814_vm3, %v3208_v57, 0.0  ;;  %vm3846_vm6 = vcmp.eq.s32.totalorder %v1037_v22, 1 }
  0xcb   :  { %v1118_v44 = vadd.f32 %v1117_v6, %v1092_v39  ;;  %v1133_v59 = vadd.f32 %v1132_v8, %v1093_v30  ;;  %v1154_v2 = vmax.f32 %v1152_v62, %v1153_v63  ;;  %v1053_v7 = vrot.slane %v3774_v38, %v2993_v4 }
  0xcc   :  { %vm3852_vm7 = vcmp.eq.s32.totalorder %v1041_v37, 1  ;;  %v1096_v56 = vsel %vm3833_vm5, %v3228_v12, 0.0  ;;  %v1097_v57 = vsel %vm3833_vm5, %v3230_v16, 0.0  ;;  %v1098_v38 = vsel %vm3846_vm6, %v3246_v28, 0.0 }
  0xcd   :  { %v1119_v61 = vadd.f32 %v1118_v44, %v1094_v48  ;;  %v1134_v52 = vadd.f32 %v1133_v59, %v1095_v50  ;;  %vm1155_vm8 = vcmp.eq.f32.partialorder %v3682_v13, %v1154_v2  ;;  %vm1156_vm9 = vcmp.eq.f32.partialorder %v3685_v58, %v1154_v2 }
  0xce   :  { %v1099_v21 = vsel %vm3846_vm6, %v3248_v31, 0.0  ;;  %v1157_v12 = vsel %vm1155_vm8, %v2985_v1, 16  ;;  %v1158_v14 = vsel %vm1156_vm9, %v2990_v3, 16  ;;  %vm3872_vm10 = vcmp.eq.s32.totalorder %v1045_v0, 1 }
  0xcf   :  { %v1120_v60 = vadd.f32 %v1119_v61, %v1096_v56  ;;  %v1135_v9 = vadd.f32 %v1134_v52, %v1097_v57  ;;  %vm1159_vm11 = vcmp.lt.s32.totalorder %v1157_v12, %v1158_v14  ;;  %v1057_v20 = vrot.slane %v3789_v34, %v2993_v4 }
  0xd0   :  { %v1100_v28 = vsel %vm3852_vm7, %v3266_v42, 0.0  ;;  %v1101_v31 = vsel %vm3852_vm7, %v3268_v45, 0.0  ;;  %v1160_v36 = vsel %vm1159_vm11, %v1157_v12, %v1158_v14  ;;  %vm3884_vm12 = vcmp.eq.s32.totalorder %v1049_v47, 1 }
  0xd1   :  { %v1121_v24 = vadd.f32 %v1120_v60, %v1098_v38  ;;  %v1136_v25 = vadd.f32 %v1135_v9, %v1099_v21  ;;  %v1161_v18 = vrot.slane %v1160_v36, 4  ;;  %v1061_v26 = vrot.slane %v3805_v41, %v2993_v4 }
  0xd2   :  { %v1102_v34 = vsel %vm3872_vm10, %v3280_v51, 0.0  ;;  %v1103_v42 = vsel %vm3872_vm10, %v3282_v53, 0.0  ;;  %v1173_v45 = vsel %vm1172_vm4, 1, %v2958_v5  ;;  %vm3899_vm13 = vcmp.eq.s32.totalorder %v1053_v7, 1 }
  0xd3   :  { %v1122_v62 = vadd.f32 %v1121_v24, %v1100_v28  ;;  %v1137_v37 = vadd.f32 %v1136_v25, %v1101_v31  ;;  %vm1162_vm14 = vcmp.lt.s32.totalorder %v1160_v36, %v1161_v18  ;;  %v1065_v41 = vrot.slane %v3824_v32, %v2993_v4 }
  0xd4   :  { %v1104_v51 = vsel %vm3884_vm12, %v3296_v10, 0.0  ;;  %v1105_v53 = vsel %vm3884_vm12, %v3298_v11, 0.0  ;;  %v1163_v39 = vsel %vm1162_vm14, %v1160_v36, %v1161_v18  ;;  %vm3911_vm15 = vcmp.eq.s32.totalorder %v1057_v20, 1 }
  0xd5   :  { %v1123_v17 = vadd.f32 %v1122_v62, %v1102_v34  ;;  %v1138_v6 = vadd.f32 %v1137_v37, %v1103_v42  ;;  %v1164_v8 = vrot.slane %v1163_v39, 2  ;;  %v1106_v32 = vsel %vm3899_vm13, %v3315_v23, 0.0 }
  0xd6   :  { %v1107_v10 = vsel %vm3899_vm13, %v3317_v33, 0.0  ;;  %vm3921_vm0 = vcmp.eq.s32.totalorder %v1061_v26, 1  ;;  %v1108_v47 = vsel %vm3911_vm15, %v3331_v46, 0.0  ;;  %v1109_v48 = vsel %vm3911_vm15, %v3333_v27, 0.0  ;;  %v4002_v33 = vld [vmem:[#allocation5] sm:$0xff] }
  0xd7   :  { %v1124_v11 = vadd.f32 %v1123_v17, %v1104_v51  ;;  %v1139_v0 = vadd.f32 %v1138_v6, %v1105_v53  ;;  %vm1165_vm1 = vcmp.lt.s32.totalorder %v1163_v39, %v1164_v8  ;;  %v1177_v50 = vrot.slane %v1173_v45, %v2993_v4  ;;  %5654 = vst [vmem:[#allocation11_spill] sm:$0xff] %v4002_v33 }
  0xd8   :  { %v1166_v23 = vsel %vm1165_vm1, %v1163_v39, %v1164_v8  ;;  %vm3932_vm2 = vcmp.eq.s32.totalorder %v1065_v41, 1  ;;  %v1110_v2 = vsel %vm3921_vm0, %v3345_v54, 0.0  ;;  %v1111_v46 = vsel %vm3921_vm0, %v3347_v55, 0.0  ;;  %v4042_v55 = vld [vmem:[#allocation5 + $0x28] sm:$0xff] }
  0xd9   :  { %v1125_v49 = vadd.f32 %v1124_v11, %v1106_v32  ;;  %v1140_v44 = vadd.f32 %v1139_v0, %v1107_v10  ;;  %v1167_v59 = vrot.slane %v1166_v23, 1  ;;  %v1112_v35 = vsel %vm3932_vm2, %v3360_v19, 0.0 }
  0xda   :  { %v1113_v56 = vsel %vm3932_vm2, %v3362_v43, 0.0  ;;  %vm1178_vm5 = vcmp.eq.s32.totalorder %v1177_v50, 1 }
  0xdb   :  { %v1126_v7 = vadd.f32 %v1125_v49, %v1108_v47  ;;  %v1141_v27 = vadd.f32 %v1140_v44, %v1109_v48  ;;  %vm1168_vm3 = vcmp.lt.s32.totalorder %v1166_v23, %v1167_v59 }
  0xdc   :  { %v1169_v57 = vsel %vm1168_vm3, %v1166_v23, %v1167_v59  ;;  %v4009_v59 = vld [vmem:[#allocation5 + $0x8] sm:$0xff]  ;;  %v4137_v23 = vld [vmem:[#allocation5 + $0x60] sm:$0xff] }
  0xdd   :  { %v1127_v61 = vadd.f32 %v1126_v7, %v1110_v2  ;;  %v1142_v52 = vadd.f32 %v1141_v27, %v1111_v46  ;;  %vm1170_vm4 = vcmp.eq.s32.totalorder %v2985_v1, %v1169_v57  ;;  %vm1171_vm7 = vcmp.eq.s32.totalorder %v2990_v3, %v1169_v57  ;;  %5657 = vst [vmem:[#allocation12_spill] sm:$0xff] %v4009_v59  ;;  %v4011_v2 = vld [vmem:[#allocation5 + $0x10] sm:$0xff]  ;;  %v4013_v46 = vld [vmem:[#allocation5 + $0x18] sm:$0xff] }
  0xde   :  { %vm3949_vm6 = vmand %vm1170_vm4, %vm1178_vm5  ;;  %5658 = vst [vmem:[#allocation13_spill] sm:$0xff] %v4011_v2 }
  0xdf   :  { %v1128_v54 = vadd.f32 %v1127_v61, %v1112_v35  ;;  %v1143_v38 = vadd.f32 %v1142_v52, %v1113_v56  ;;  %v1213_v19 = vsel %vm3949_vm6, 1, %v2958_v5  ;;  %vm1180_vm8 = vmand %vm1171_vm7, %vm1178_vm5  ;;  %v3967_v24 = vsel %vm3949_vm6, -inf, %v3682_v13  ;;  %5659 = vst [vmem:[#allocation14_spill] sm:$0xff] %v4013_v46 }
  0xe0   :  { %v1222_v43 = vrot.slane %v1213_v19, %v3022_v15  ;;  %v1215_v21 = vcombine.high %v1213_v19, %v1213_v19  ;;  %v1214_v12 = vsel %vm1180_vm8, 1, %v2958_v5  ;;  %v3970_v25 = vsel %vm1180_vm8, -inf, %v3685_v58 }
  0xe1   :  { %1144 = vst [vmem:[#allocation7 + $0x20] sm:$0xff] %v1128_v54  ;;  %1145 = vst [vmem:[#allocation7 + $0x28] sm:$0xff] %v1143_v38  ;;  %v1264_v16 = vcombine.high %v1214_v12, %v1214_v12  ;;  %v1271_v20 = vrot.slane %v1214_v12, %v3022_v15  ;;  %v3975_v45 = vmax.f32 %v3967_v24, %v3970_v25  ;;  %v4040_v38 = vld [vmem:[#allocation5 + $0x20] sm:$0xff] }
  0xe2   :  { %v1230_v14 = vcombine.high %v1222_v43, %v1222_v43  ;;  %v1229_v60 = vrot.slane %v1215_v21, %v3022_v15  ;;  %v1238_v9 = vrot.slane %v1222_v43, %v3022_v15  ;;  %5668 = vst [vmem:[#allocation15_spill] sm:$0xff] %v4040_v38 }
  0xe3   :  { %v1278_v31 = vrot.slane %v1264_v16, %v3022_v15  ;;  %v1279_v18 = vcombine.high %v1271_v20, %v1271_v20  ;;  %v1287_v62 = vrot.slane %v1271_v20, %v3022_v15  ;;  %v1492_v32 = vrot.slane %v3975_v45, 4  ;;  %v4067_v20 = vld [vmem:[#allocation5 + $0x30] sm:$0xff] }
  0xe4   :  { %v1252_v28 = vrot.slane %v1230_v14, %v3022_v15  ;;  %v1231_v36 = vcombine.high %v1229_v60, %v1229_v60  ;;  %v1260_v22 = vcombine.high %v1238_v9, %v1238_v9  ;;  %vm1313_vm9 = vcmp.ne.s32.totalorder %v1238_v9, 0 }
  0xe5   :  { %v1280_v34 = vcombine.high %v1278_v31, %v1278_v31  ;;  %v1245_v42 = vrot.slane %v1229_v60, %v3022_v15  ;;  %v1294_v13 = vrot.slane %v1278_v31, %v3022_v15  ;;  %v1301_v37 = vrot.slane %v1279_v18, %v3022_v15  ;;  %v4179_v18 = vld [vmem:[#allocation5 + $0x88] sm:$0xff] }
  0xe6   :  { %v1262_v26 = vcombine.high %v1252_v28, %v1252_v28  ;;  %vm1314_vm10 = vcmp.ne.s32.totalorder %v1252_v28, 0  ;;  %v1259_v29 = vrot.slane %v1231_v36, %v3022_v15  ;;  %vm1315_vm11 = vcmp.ne.s32.totalorder %v1260_v22, 0  ;;  %v4069_v28 = vld [vmem:[#allocation5 + $0x38] sm:$0xff] }
  0xe7   :  { %v1261_v58 = vcombine.high %v1245_v42, %v1245_v42  ;;  %v1329_v41 = vsel %vm1313_vm9, 1, %v2958_v5  ;;  %v1330_v51 = vsel %vm1314_vm10, 1, %v2958_v5  ;;  %v1308_v39 = vrot.slane %v1280_v34, %v3022_v15 }
  0xe8   :  { %v1263_v53 = vcombine.high %v1259_v29, %v1259_v29  ;;  %v1309_v30 = vcombine.high %v1287_v62, %v1287_v62  ;;  %vm1316_vm12 = vcmp.ne.s32.totalorder %v1262_v26, 0  ;;  %v1310_v17 = vcombine.high %v1294_v13, %v1294_v13 }
  0xe9   :  { %v1311_v6 = vcombine.high %v1301_v37, %v1301_v37  ;;  %v1331_v8 = vsel %vm1315_vm11, 1, %v2958_v5  ;;  %v1312_v10 = vcombine.high %v1308_v39, %v1308_v39  ;;  %vm1317_vm13 = vcmp.ne.s32.totalorder %v1245_v42, 0 }
  0xea   :  { %v1348_v63 = vrot.slane %v1329_v41, %v2993_v4  ;;  %v1352_v11 = vrot.slane %v1330_v51, %v2993_v4  ;;  %vm1318_vm14 = vcmp.ne.s32.totalorder %v1259_v29, 0  ;;  %vm3988_vm15 = vcmp.ne.s32.totalorder %v1261_v58, 0  ;;  %v4099_v58 = vld [vmem:[#allocation5 + $0x48] sm:$0xff] }
  0xeb   :  { %vm1321_vm0 = vcmp.ne.s32.totalorder %v1287_v62, 0  ;;  %v1332_v47 = vsel %vm1316_vm12, 1, %v2958_v5  ;;  %vm3993_vm1 = vcmp.ne.s32.totalorder %v1263_v53, 0  ;;  %vm1322_vm2 = vcmp.ne.s32.totalorder %v1301_v37, 0  ;;  %v4097_v62 = vld [vmem:[#allocation5 + $0x40] sm:$0xff] }
  0xec   :  { %vm3997_vm3 = vcmp.ne.s32.totalorder %v1309_v30, 0  ;;  %v1356_v50 = vrot.slane %v1331_v8, %v2993_v4  ;;  %vm4004_vm4 = vcmp.ne.s32.totalorder %v1311_v6, 0  ;;  %vm1325_vm5 = vcmp.ne.s32.totalorder %v1294_v13, 0  ;;  %v4117_v8 = vld [vmem:[#allocation5 + $0x50] sm:$0xff] }
  0xed   :  { %vm1326_vm6 = vcmp.ne.s32.totalorder %v1308_v39, 0  ;;  %v1333_v44 = vsel %vm1317_vm13, 1, %v2958_v5  ;;  %vm4015_vm7 = vcmp.ne.s32.totalorder %v1310_v17, 0  ;;  %v1360_v27 = vrot.slane %v1332_v47, %v2993_v4 }
  0xee   :  { %vm4020_vm8 = vcmp.eq.s32.totalorder %v1348_v63, 1  ;;  %vm4024_vm9 = vcmp.eq.s32.totalorder %v1352_v11, 1  ;;  %vm4028_vm10 = vcmp.ne.s32.totalorder %v1312_v10, 0  ;;  %v1334_v61 = vsel %vm1318_vm14, 1, %v2958_v5  ;;  %v4119_v10 = vld [vmem:[#allocation5 + $0x58] sm:$0xff] }
  0xef   :  { %v1335_v52 = vsel %vm3988_vm15, 1, %v2958_v5  ;;  %v1336_v54 = vsel %vm3993_vm1, 1, %v2958_v5  ;;  %v1337_v19 = vsel %vm1321_vm0, 1, %v2958_v5  ;;  %v4048_v43 = vsel %vm1322_vm2, 1, %v2958_v5 }
  0xf0   :  { %v1364_v21 = vrot.slane %v1333_v44, %v2993_v4  ;;  %vm4051_vm11 = vcmp.eq.s32.totalorder %v1356_v50, 1  ;;  %v1425_v14 = vsel %vm4020_vm8, %v4002_v33, 0.0  ;;  %v1426_v16 = vsel %vm4020_vm8, %v4009_v59, 0.0  ;;  %v4139_v50 = vld [vmem:[#allocation5 + $0x68] sm:$0xff] }
  0xf1   :  { %v1427_v60 = vsel %vm4024_vm9, %v4011_v2, 0.0  ;;  %v1428_v9 = vsel %vm4024_vm9, %v4013_v46, 0.0  ;;  %v4074_v31 = vsel %vm3997_vm3, 1, %v2958_v5  ;;  %v4079_v36 = vsel %vm4004_vm4, 1, %v2958_v5 }
  0xf2   :  { %v1368_v22 = vrot.slane %v1334_v61, %v2993_v4  ;;  %vm4082_vm12 = vcmp.eq.s32.totalorder %v1360_v27, 1  ;;  %v4088_v26 = vsel %vm1325_vm5, 1, %v2958_v5  ;;  %v1372_v34 = vrot.slane %v1335_v52, %v2993_v4 }
  0xf3   :  { %v1429_v42 = vsel %vm4051_vm11, %v4040_v38, 0.0  ;;  %v1430_v29 = vsel %vm4051_vm11, %v4042_v55, 0.0  ;;  %vm4101_vm13 = vcmp.eq.s32.totalorder %v1364_v21, 1  ;;  %v1457_v13 = vadd.f32 %v1427_v60, %v1425_v14 }
  0xf4   :  { %v1472_v41 = vadd.f32 %v1428_v9, %v1426_v16  ;;  %v1493_v51 = vmax.f32 %v3975_v45, %v1492_v32  ;;  %v4108_v53 = vsel %vm1326_vm6, 1, %v2958_v5  ;;  %v1376_v30 = vrot.slane %v1336_v54, %v2993_v4  ;;  %v4159_v54 = vld [vmem:[#allocation5 + $0x70] sm:$0xff] }
  0xf5   :  { %v1431_v17 = vsel %vm4082_vm12, %v4067_v20, 0.0  ;;  %v1432_v6 = vsel %vm4082_vm12, %v4069_v28, 0.0  ;;  %vm4121_vm14 = vcmp.eq.s32.totalorder %v1368_v22, 1  ;;  %v1458_v39 = vadd.f32 %v1457_v13, %v1429_v42  ;;  %v4177_v22 = vld [vmem:[#allocation5 + $0x80] sm:$0xff] }
  0xf6   :  { %v1473_v32 = vadd.f32 %v1472_v41, %v1430_v29  ;;  %v1494_v63 = vrot.slane %v1493_v51, 2  ;;  %v4128_v11 = vsel %vm4015_vm7, 1, %v2958_v5  ;;  %v1380_v0 = vrot.slane %v1337_v19, %v2993_v4  ;;  %v4161_v19 = vld [vmem:[#allocation5 + $0x78] sm:$0xff] }
  0xf7   :  { %v1433_v47 = vsel %vm4101_vm13, %v4097_v62, 0.0  ;;  %v1434_v48 = vsel %vm4101_vm13, %v4099_v58, 0.0  ;;  %vm4141_vm15 = vcmp.eq.s32.totalorder %v1372_v34, 1  ;;  %v1459_v44 = vadd.f32 %v1458_v39, %v1431_v17  ;;  %v4248_v34 = vld [vmem:[#allocation5 + $0xc8] sm:$0xff] }
  0xf8   :  { %v1474_v7 = vadd.f32 %v1473_v32, %v1432_v6  ;;  %v1495_v27 = vmax.f32 %v1493_v51, %v1494_v63  ;;  %vm1515_vm0 = vcmp.gt.s32.totalorder %v3818_v40, 4  ;;  %v4149_v35 = vsel %vm4028_vm10, 1, %v2958_v5  ;;  %v4197_v51 = vld [vmem:[#allocation5 + $0x90] sm:$0xff]  ;;  %v4211_v63 = vld [vmem:[#allocation5 + $0xa0] sm:$0xff] }
  0xf9   :  { %v1384_v56 = vrot.slane %v4048_v43, %v2993_v4  ;;  %v1435_v61 = vsel %vm4121_vm14, %v4117_v8, 0.0  ;;  %v1436_v52 = vsel %vm4121_vm14, %v4119_v10, 0.0  ;;  %vm4163_vm1 = vcmp.eq.s32.totalorder %v1376_v30, 1  ;;  %v4199_v30 = vld [vmem:[#allocation5 + $0x98] sm:$0xff] }
  0xfa   :  { %v1460_v57 = vadd.f32 %v1459_v44, %v1433_v47  ;;  %v1475_v12 = vadd.f32 %v1474_v7, %v1434_v48  ;;  %v1496_v14 = vrot.slane %v1495_v27, 1  ;;  %v1388_v43 = vrot.slane %v4074_v31, %v2993_v4  ;;  %v4276_v47 = vld [vmem:[#allocation5 + $0xe0] sm:$0xff] }
  0xfb   :  { %v1392_v16 = vrot.slane %v4079_v36, %v2993_v4  ;;  %v1437_v60 = vsel %vm4141_vm15, %v4137_v23, 0.0  ;;  %v1438_v9 = vsel %vm4141_vm15, %v4139_v50, 0.0  ;;  %vm4181_vm2 = vcmp.eq.s32.totalorder %v1380_v0, 1  ;;  %v4213_v0 = vld [vmem:[#allocation5 + $0xa8] sm:$0xff] }
  0xfc   :  { %v1461_v31 = vadd.f32 %v1460_v57, %v1435_v61  ;;  %v1476_v42 = vadd.f32 %v1475_v12, %v1436_v52  ;;  %v1497_v29 = vmax.f32 %v1495_v27, %v1496_v14  ;;  %v1396_v36 = vrot.slane %v4088_v26, %v2993_v4  ;;  %v4227_v61 = vld [vmem:[#allocation5 + $0xb0] sm:$0xff]  ;;  %v4229_v52 = vld [vmem:[#allocation5 + $0xb8] sm:$0xff] }
  0xfd   :  { %vm4187_vm3 = vcmp.eq.s32.totalorder %v1384_v56, 1  ;;  %v1439_v13 = vsel %vm4163_vm1, %v4159_v54, 0.0  ;;  %v1440_v41 = vsel %vm4163_vm1, %v4161_v19, 0.0  ;;  %v1441_v26 = vsel %vm4181_vm2, %v4177_v22, 0.0 }
  0xfe   :  { %v1462_v17 = vadd.f32 %v1461_v31, %v1437_v60  ;;  %v1477_v6 = vadd.f32 %v1476_v42, %v1438_v9  ;;  %vm1498_vm4 = vcmp.eq.f32.partialorder %v3967_v24, %v1497_v29  ;;  %vm1499_vm5 = vcmp.eq.f32.partialorder %v3970_v25, %v1497_v29  ;;  %v4246_v9 = vld [vmem:[#allocation5 + $0xc0] sm:$0xff] }
  0xff   :  { %v1442_v45 = vsel %vm4181_vm2, %v4179_v18, 0.0  ;;  %v1500_v39 = vsel %vm1498_vm4, %v2985_v1, 16  ;;  %v1501_v32 = vsel %vm1499_vm5, %v2990_v3, 16  ;;  %vm4215_vm6 = vcmp.eq.s32.totalorder %v1388_v43, 1 }
 0x100   :  { %v1463_v48 = vadd.f32 %v1462_v17, %v1439_v13  ;;  %v1478_v49 = vadd.f32 %v1477_v6, %v1440_v41  ;;  %vm1502_vm7 = vcmp.lt.s32.totalorder %v1500_v39, %v1501_v32  ;;  %v1400_v44 = vrot.slane %v4108_v53, %v2993_v4  ;;  %v4262_v17 = vld [vmem:[#allocation5 + $0xd0] sm:$0xff] }
 0x101   :  { %v1443_v7 = vsel %vm4187_vm3, %v4197_v51, 0.0  ;;  %v1444_v27 = vsel %vm4187_vm3, %v4199_v30, 0.0  ;;  %v1503_v56 = vsel %vm1502_vm7, %v1500_v39, %v1501_v32  ;;  %vm4231_vm8 = vcmp.eq.s32.totalorder %v1392_v16, 1 }
 0x102   :  { %v1464_v57 = vadd.f32 %v1463_v48, %v1441_v26  ;;  %v1479_v12 = vadd.f32 %v1478_v49, %v1442_v45  ;;  %v1504_v53 = vrot.slane %v1503_v56, 4  ;;  %v1404_v14 = vrot.slane %v4128_v11, %v2993_v4  ;;  %v4278_v48 = vld [vmem:[#allocation5 + $0xe8] sm:$0xff] }
 0x103   :  { %v1445_v43 = vsel %vm4215_vm6, %v4211_v63, 0.0  ;;  %v1446_v60 = vsel %vm4215_vm6, %v4213_v0, 0.0  ;;  %v1516_v16 = vsel %vm1515_vm0, 1, %v2958_v5  ;;  %vm4250_vm9 = vcmp.eq.s32.totalorder %v1396_v36, 1  ;;  %v4264_v36 = vld [vmem:[#allocation5 + $0xd8] sm:$0xff] }
 0x104   :  { %v1465_v11 = vadd.f32 %v1464_v57, %v1443_v7  ;;  %v1480_v42 = vadd.f32 %v1479_v12, %v1444_v27  ;;  %vm1505_vm10 = vcmp.lt.s32.totalorder %v1503_v56, %v1504_v53  ;;  %v1408_v29 = vrot.slane %v4149_v35, %v2993_v4  ;;  %v4291_v12 = vld [vmem:[#allocation5 + $0xf0] sm:$0xff] }
 0x105   :  { %v1447_v37 = vsel %vm4231_vm8, %v4227_v61, 0.0  ;;  %v1448_v13 = vsel %vm4231_vm8, %v4229_v52, 0.0  ;;  %v1506_v41 = vsel %vm1505_vm10, %v1503_v56, %v1504_v53  ;;  %vm4266_vm11 = vcmp.eq.s32.totalorder %v1400_v44, 1  ;;  %v4293_v53 = vld [vmem:[#allocation5 + $0xf8] sm:$0xff] }
 0x106   :  { %v1466_v26 = vadd.f32 %v1465_v11, %v1445_v43  ;;  %v1481_v45 = vadd.f32 %v1480_v42, %v1446_v60  ;;  %v1507_v35 = vrot.slane %v1506_v41, 2  ;;  %v1449_v39 = vsel %vm4250_vm9, %v4246_v9, 0.0 }
 0x107   :  { %v1450_v32 = vsel %vm4250_vm9, %v4248_v34, 0.0  ;;  %vm4280_vm12 = vcmp.eq.s32.totalorder %v1404_v14, 1  ;;  %v1451_v27 = vsel %vm4266_vm11, %v4262_v17, 0.0  ;;  %v1452_v56 = vsel %vm4266_vm11, %v4264_v36, 0.0 }
 0x108   :  { %v1467_v44 = vadd.f32 %v1466_v26, %v1447_v37  ;;  %v1482_v7 = vadd.f32 %v1481_v45, %v1448_v13  ;;  %vm1508_vm13 = vcmp.lt.s32.totalorder %v1506_v41, %v1507_v35  ;;  %v1520_v57 = vrot.slane %v1516_v16, %v2993_v4 }
 0x109   :  { %v1509_v21 = vsel %vm1508_vm13, %v1506_v41, %v1507_v35  ;;  %vm4295_vm14 = vcmp.eq.s32.totalorder %v1408_v29, 1  ;;  %v1453_v11 = vsel %vm4280_vm12, %v4276_v47, 0.0  ;;  %v1454_v42 = vsel %vm4280_vm12, %v4278_v48, 0.0 }
 0x10a   :  { %v1468_v43 = vadd.f32 %v1467_v44, %v1449_v39  ;;  %v1483_v60 = vadd.f32 %v1482_v7, %v1450_v32  ;;  %v1510_v31 = vrot.slane %v1509_v21, 1  ;;  %v1455_v29 = vsel %vm4295_vm14, %v4291_v12, 0.0 }
 0x10b   :  { %v1456_v13 = vsel %vm4295_vm14, %v4293_v53, 0.0  ;;  %vm1521_vm1 = vcmp.eq.s32.totalorder %v1520_v57, 1 }
 0x10c   :  { %v1469_v16 = vadd.f32 %v1468_v43, %v1451_v27  ;;  %v1484_v37 = vadd.f32 %v1483_v60, %v1452_v56  ;;  %vm1511_vm15 = vcmp.lt.s32.totalorder %v1509_v21, %v1510_v31 }
 0x10d   :  { %v1512_v41 = vsel %vm1511_vm15, %v1509_v21, %v1510_v31 }
 0x10e   :  { %v1470_v6 = vadd.f32 %v1469_v16, %v1453_v11  ;;  %v1485_v26 = vadd.f32 %v1484_v37, %v1454_v42  ;;  %vm1513_vm0 = vcmp.eq.s32.totalorder %v2985_v1, %v1512_v41  ;;  %vm1514_vm3 = vcmp.eq.s32.totalorder %v2990_v3, %v1512_v41 }
 0x10f   :  { %vm4312_vm2 = vmand %vm1513_vm0, %vm1521_vm1 }
 0x110   :  { %v1471_v45 = vadd.f32 %v1470_v6, %v1455_v29  ;;  %v1486_v35 = vadd.f32 %v1485_v26, %v1456_v13  ;;  %v1556_v32 = vsel %vm4312_vm2, 1, %v2958_v5  ;;  %vm1523_vm4 = vmand %vm1514_vm3, %vm1521_vm1  ;;  %v4330_v42 = vsel %vm4312_vm2, -inf, %v3967_v24 }
 0x111   :  { %v1565_v49 = vrot.slane %v1556_v32, %v3022_v15  ;;  %v1558_v44 = vcombine.high %v1556_v32, %v1556_v32  ;;  %v1557_v7 = vsel %vm1523_vm4, 1, %v2958_v5  ;;  %v4333_v16 = vsel %vm1523_vm4, -inf, %v3970_v25 }
 0x112   :  { %1487 = vst [vmem:[#allocation7 + $0x30] sm:$0xff] %v1471_v45  ;;  %1488 = vst [vmem:[#allocation7 + $0x38] sm:$0xff] %v1486_v35  ;;  %v1607_v56 = vcombine.high %v1557_v7, %v1557_v7  ;;  %v1614_v14 = vrot.slane %v1557_v7, %v3022_v15  ;;  %v1834_v6 = vmax.f32 %v4330_v42, %v4333_v16 }
 0x113   :  { %v1573_v27 = vcombine.high %v1565_v49, %v1565_v49  ;;  %v1572_v21 = vrot.slane %v1558_v44, %v3022_v15  ;;  %v1581_v57 = vrot.slane %v1565_v49, %v3022_v15 }
 0x114   :  { %v1621_v60 = vrot.slane %v1607_v56, %v3022_v15  ;;  %v1622_v37 = vcombine.high %v1614_v14, %v1614_v14  ;;  %v1630_v45 = vrot.slane %v1614_v14, %v3022_v15 }
 0x115   :  { %v1595_v43 = vrot.slane %v1573_v27, %v3022_v15  ;;  %v1574_v31 = vcombine.high %v1572_v21, %v1572_v21  ;;  %v1603_v11 = vcombine.high %v1581_v57, %v1581_v57  ;;  %vm1656_vm5 = vcmp.ne.s32.totalorder %v1581_v57, 0 }
 0x116   :  { %v1623_v13 = vcombine.high %v1621_v60, %v1621_v60  ;;  %v1588_v41 = vrot.slane %v1572_v21, %v3022_v15  ;;  %v1637_v24 = vrot.slane %v1621_v60, %v3022_v15  ;;  %v1644_v25 = vrot.slane %v1622_v37, %v3022_v15 }
 0x117   :  { %v1605_v29 = vcombine.high %v1595_v43, %v1595_v43  ;;  %vm1657_vm6 = vcmp.ne.s32.totalorder %v1595_v43, 0  ;;  %v1602_v26 = vrot.slane %v1574_v31, %v3022_v15  ;;  %vm1658_vm7 = vcmp.ne.s32.totalorder %v1603_v11, 0 }
 0x118   :  { %v1604_v35 = vcombine.high %v1588_v41, %v1588_v41  ;;  %v1672_v39 = vsel %vm1656_vm5, 1, %v2958_v5  ;;  %v1673_v32 = vsel %vm1657_vm6, 1, %v2958_v5  ;;  %v1651_v44 = vrot.slane %v1623_v13, %v3022_v15 }
 0x119   :  { %v1606_v49 = vcombine.high %v1602_v26, %v1602_v26  ;;  %v1652_v7 = vcombine.high %v1630_v45, %v1630_v45  ;;  %vm1659_vm8 = vcmp.ne.s32.totalorder %v1605_v29, 0  ;;  %v1653_v27 = vcombine.high %v1637_v24, %v1637_v24 }
 0x11a   :  { %v1654_v56 = vcombine.high %v1644_v25, %v1644_v25  ;;  %v1674_v21 = vsel %vm1658_vm7, 1, %v2958_v5  ;;  %v1835_v57 = vrot.slane %v1834_v6, 4  ;;  %v1655_v14 = vcombine.high %v1651_v44, %v1651_v44 }
 0x11b   :  { %vm1660_vm9 = vcmp.ne.s32.totalorder %v1588_v41, 0  ;;  %v1691_v43 = vrot.slane %v1672_v39, %v2993_v4  ;;  %v1695_v60 = vrot.slane %v1673_v32, %v2993_v4  ;;  %vm1661_vm10 = vcmp.ne.s32.totalorder %v1602_v26, 0 }
 0x11c   :  { %vm4348_vm11 = vcmp.ne.s32.totalorder %v1604_v35, 0  ;;  %vm1664_vm12 = vcmp.ne.s32.totalorder %v1630_v45, 0  ;;  %v1675_v11 = vsel %vm1659_vm8, 1, %v2958_v5  ;;  %vm1663_vm13 = vcmp.ne.s32.totalorder %v1606_v49, 0 }
 0x11d   :  { %vm1665_vm14 = vcmp.ne.s32.totalorder %v1644_v25, 0  ;;  %vm4353_vm15 = vcmp.ne.s32.totalorder %v1652_v7, 0  ;;  %v1699_v29 = vrot.slane %v1674_v21, %v2993_v4  ;;  %vm4358_vm0 = vcmp.ne.s32.totalorder %v1654_v56, 0 }
 0x11e   :  { %vm1668_vm1 = vcmp.ne.s32.totalorder %v1637_v24, 0  ;;  %vm1669_vm2 = vcmp.ne.s32.totalorder %v1651_v44, 0  ;;  %v1676_v41 = vsel %vm1660_vm9, 1, %v2958_v5  ;;  %vm4363_vm3 = vcmp.ne.s32.totalorder %v1653_v27, 0 }
 0x11f   :  { %v1703_v39 = vrot.slane %v1675_v11, %v2993_v4  ;;  %vm4368_vm4 = vcmp.eq.s32.totalorder %v1691_v43, 1  ;;  %vm4372_vm5 = vcmp.eq.s32.totalorder %v1695_v60, 1  ;;  %vm4376_vm6 = vcmp.ne.s32.totalorder %v1655_v14, 0 }
 0x120   :  { %v1677_v27 = vsel %vm1661_vm10, 1, %v2958_v5  ;;  %v1678_v56 = vsel %vm4348_vm11, 1, %v2958_v5  ;;  %v1679_v21 = vsel %vm1663_vm13, 1, %v2958_v5  ;;  %v1680_v43 = vsel %vm1664_vm12, 1, %v2958_v5 }
 0x121   :  { %v1681_v60 = vsel %vm1665_vm14, 1, %v2958_v5  ;;  %v1707_v14 = vrot.slane %v1676_v41, %v2993_v4  ;;  %vm4391_vm7 = vcmp.eq.s32.totalorder %v1699_v29, 1  ;;  %v1768_v26 = vsel %vm4368_vm4, %v4002_v33, 0.0 }
 0x122   :  { %v1769_v31 = vsel %vm4368_vm4, %v4009_v59, 0.0  ;;  %v1770_v45 = vsel %vm4372_vm5, %v4011_v2, 0.0  ;;  %v1771_v25 = vsel %vm4372_vm5, %v4013_v46, 0.0  ;;  %v1682_v29 = vsel %vm4353_vm15, 1, %v2958_v5 }
 0x123   :  { %v4413_v41 = vsel %vm4358_vm0, 1, %v2958_v5  ;;  %v1711_v32 = vrot.slane %v1677_v27, %v2993_v4  ;;  %vm4416_vm8 = vcmp.eq.s32.totalorder %v1703_v39, 1  ;;  %v4422_v2 = vsel %vm1668_vm1, 1, %v2958_v5 }
 0x124   :  { %v1715_v49 = vrot.slane %v1678_v56, %v2993_v4  ;;  %v1772_v37 = vsel %vm4391_vm7, %v4040_v38, 0.0  ;;  %v1773_v13 = vsel %vm4391_vm7, %v4042_v55, 0.0  ;;  %vm4431_vm9 = vcmp.eq.s32.totalorder %v1707_v14, 1 }
 0x125   :  { %v1800_v39 = vadd.f32 %v1770_v45, %v1768_v26  ;;  %v1815_v46 = vadd.f32 %v1771_v25, %v1769_v31  ;;  %v1836_v33 = vmax.f32 %v1834_v6, %v1835_v57  ;;  %v4437_v24 = vsel %vm1669_vm2, 1, %v2958_v5 }
 0x126   :  { %v1719_v56 = vrot.slane %v1679_v21, %v2993_v4  ;;  %v1774_v38 = vsel %vm4416_vm8, %v4067_v20, 0.0  ;;  %v1775_v14 = vsel %vm4416_vm8, %v4069_v28, 0.0  ;;  %vm4446_vm10 = vcmp.eq.s32.totalorder %v1711_v32, 1 }
 0x127   :  { %v1801_v26 = vadd.f32 %v1800_v39, %v1772_v37  ;;  %v1816_v6 = vadd.f32 %v1815_v46, %v1773_v13  ;;  %v1837_v57 = vrot.slane %v1836_v33, 2  ;;  %v4453_v44 = vsel %vm4363_vm3, 1, %v2958_v5 }
 0x128   :  { %v1723_v21 = vrot.slane %v1680_v43, %v2993_v4  ;;  %v1776_v31 = vsel %vm4431_vm9, %v4097_v62, 0.0  ;;  %v1777_v59 = vsel %vm4431_vm9, %v4099_v58, 0.0  ;;  %vm4462_vm11 = vcmp.eq.s32.totalorder %v1715_v49, 1 }
 0x129   :  { %v1802_v46 = vadd.f32 %v1801_v26, %v1774_v38  ;;  %v1817_v25 = vadd.f32 %v1816_v6, %v1775_v14  ;;  %v1838_v32 = vmax.f32 %v1836_v33, %v1837_v57  ;;  %vm1858_vm12 = vcmp.gt.s32.totalorder %v3818_v40, 5 }
 0x12a   :  { %v4470_v35 = vsel %vm4376_vm6, 1, %v2958_v5  ;;  %v1727_v43 = vrot.slane %v1681_v60, %v2993_v4  ;;  %v1778_v37 = vsel %vm4446_vm10, %v4117_v8, 0.0  ;;  %v1779_v49 = vsel %vm4446_vm10, %v4119_v10, 0.0 }
 0x12b   :  { %vm4479_vm13 = vcmp.eq.s32.totalorder %v1719_v56, 1  ;;  %v1803_v33 = vadd.f32 %v1802_v46, %v1776_v31  ;;  %v1818_v13 = vadd.f32 %v1817_v25, %v1777_v59  ;;  %v1839_v27 = vrot.slane %v1838_v32, 1 }
 0x12c   :  { %v1731_v7 = vrot.slane %v1682_v29, %v2993_v4  ;;  %v1735_v60 = vrot.slane %v4413_v41, %v2993_v4  ;;  %v1780_v39 = vsel %vm4462_vm11, %v4137_v23, 0.0  ;;  %v1781_v14 = vsel %vm4462_vm11, %v4139_v50, 0.0 }
 0x12d   :  { %vm4492_vm14 = vcmp.eq.s32.totalorder %v1723_v21, 1  ;;  %v1804_v11 = vadd.f32 %v1803_v33, %v1778_v37  ;;  %v1819_v26 = vadd.f32 %v1818_v13, %v1779_v49  ;;  %v1840_v6 = vmax.f32 %v1838_v32, %v1839_v27 }
 0x12e   :  { %v1739_v29 = vrot.slane %v4422_v2, %v2993_v4  ;;  %vm4498_vm15 = vcmp.eq.s32.totalorder %v1727_v43, 1  ;;  %v1782_v57 = vsel %vm4479_vm13, %v4159_v54, 0.0  ;;  %v1783_v21 = vsel %vm4479_vm13, %v4161_v19, 0.0 }
 0x12f   :  { %v1805_v31 = vadd.f32 %v1804_v11, %v1780_v39  ;;  %v1820_v59 = vadd.f32 %v1819_v26, %v1781_v14  ;;  %vm1841_vm0 = vcmp.eq.f32.partialorder %v4330_v42, %v1840_v6  ;;  %vm1842_vm1 = vcmp.eq.f32.partialorder %v4333_v16, %v1840_v6 }
 0x130   :  { %v1784_v2 = vsel %vm4492_vm14, %v4177_v22, 0.0  ;;  %v1785_v45 = vsel %vm4492_vm14, %v4179_v18, 0.0  ;;  %v1843_v46 = vsel %vm1841_vm0, %v2985_v1, 16  ;;  %v1844_v25 = vsel %vm1842_vm1, %v2990_v3, 16 }
 0x131   :  { %vm4518_vm2 = vcmp.eq.s32.totalorder %v1731_v7, 1  ;;  %v1806_v43 = vadd.f32 %v1805_v31, %v1782_v57  ;;  %v1821_v37 = vadd.f32 %v1820_v59, %v1783_v21  ;;  %vm1845_vm3 = vcmp.lt.s32.totalorder %v1843_v46, %v1844_v25 }
 0x132   :  { %v1743_v49 = vrot.slane %v4437_v24, %v2993_v4  ;;  %v1786_v38 = vsel %vm4498_vm15, %v4197_v51, 0.0  ;;  %v1787_v33 = vsel %vm4498_vm15, %v4199_v30, 0.0  ;;  %v1846_v13 = vsel %vm1845_vm3, %v1843_v46, %v1844_v25 }
 0x133   :  { %vm4530_vm4 = vcmp.eq.s32.totalorder %v1735_v60, 1  ;;  %v1807_v7 = vadd.f32 %v1806_v43, %v1784_v2  ;;  %v1822_v39 = vadd.f32 %v1821_v37, %v1785_v45  ;;  %v1847_v14 = vrot.slane %v1846_v13, 4 }
 0x134   :  { %v1747_v56 = vrot.slane %v4453_v44, %v2993_v4  ;;  %v1788_v24 = vsel %vm4518_vm2, %v4211_v63, 0.0  ;;  %v1789_v11 = vsel %vm4518_vm2, %v4213_v0, 0.0  ;;  %v1859_v60 = vsel %vm1858_vm12, 1, %v2958_v5 }
 0x135   :  { %vm4545_vm5 = vcmp.eq.s32.totalorder %v1739_v29, 1  ;;  %v1808_v6 = vadd.f32 %v1807_v7, %v1786_v38  ;;  %v1823_v41 = vadd.f32 %v1822_v39, %v1787_v33  ;;  %vm1848_vm6 = vcmp.lt.s32.totalorder %v1846_v13, %v1847_v14 }
 0x136   :  { %v1751_v44 = vrot.slane %v4470_v35, %v2993_v4  ;;  %v1790_v57 = vsel %vm4530_vm4, %v4227_v61, 0.0  ;;  %v1791_v21 = vsel %vm4530_vm4, %v4229_v52, 0.0  ;;  %v1849_v40 = vsel %vm1848_vm6, %v1846_v13, %v1847_v14 }
 0x137   :  { %vm4557_vm7 = vcmp.eq.s32.totalorder %v1743_v49, 1  ;;  %v1809_v31 = vadd.f32 %v1808_v6, %v1788_v24  ;;  %v1824_v59 = vadd.f32 %v1823_v41, %v1789_v11  ;;  %v1850_v2 = vrot.slane %v1849_v40, 2 }
 0x138   :  { %v1792_v35 = vsel %vm4545_vm5, %v4246_v9, 0.0  ;;  %v1793_v45 = vsel %vm4545_vm5, %v4248_v34, 0.0  ;;  %vm4567_vm8 = vcmp.eq.s32.totalorder %v1747_v56, 1  ;;  %v1794_v43 = vsel %vm4557_vm7, %v4262_v17, 0.0 }
 0x139   :  { %v1810_v25 = vadd.f32 %v1809_v31, %v1790_v57  ;;  %v1825_v32 = vadd.f32 %v1824_v59, %v1791_v21  ;;  %vm1851_vm9 = vcmp.lt.s32.totalorder %v1849_v40, %v1850_v2  ;;  %v1795_v37 = vsel %vm4557_vm7, %v4264_v36, 0.0 }
 0x13a   :  { %v1852_v49 = vsel %vm1851_vm9, %v1849_v40, %v1850_v2  ;;  %v1863_v38 = vrot.slane %v1859_v60, %v2993_v4  ;;  %vm4578_vm10 = vcmp.eq.s32.totalorder %v1751_v44, 1  ;;  %v1796_v39 = vsel %vm4567_vm8, %v4276_v47, 0.0 }
 0x13b   :  { %v1811_v13 = vadd.f32 %v1810_v25, %v1792_v35  ;;  %v1826_v27 = vadd.f32 %v1825_v32, %v1793_v45  ;;  %v1853_v7 = vrot.slane %v1852_v49, 1  ;;  %v1797_v14 = vsel %vm4567_vm8, %v4278_v48, 0.0 }
 0x13c   :  { %v1798_v11 = vsel %vm4578_vm10, %v4291_v12, 0.0  ;;  %v1799_v60 = vsel %vm4578_vm10, %v4293_v53, 0.0  ;;  %vm1864_vm13 = vcmp.eq.s32.totalorder %v1863_v38, 1 }
 0x13d   :  { %v1812_v56 = vadd.f32 %v1811_v13, %v1794_v43  ;;  %v1827_v24 = vadd.f32 %v1826_v27, %v1795_v37  ;;  %vm1854_vm11 = vcmp.lt.s32.totalorder %v1852_v49, %v1853_v7 }
 0x13e   :  { %v1855_v26 = vsel %vm1854_vm11, %v1852_v49, %v1853_v7 }
 0x13f   :  { %v1813_v6 = vadd.f32 %v1812_v56, %v1796_v39  ;;  %v1828_v41 = vadd.f32 %v1827_v24, %v1797_v14  ;;  %vm1856_vm12 = vcmp.eq.s32.totalorder %v2985_v1, %v1855_v26  ;;  %vm1857_vm15 = vcmp.eq.s32.totalorder %v2990_v3, %v1855_v26 }
 0x140   :  { %vm4595_vm14 = vmand %vm1856_vm12, %vm1864_vm13 }
 0x141   :  { %v1814_v44 = vadd.f32 %v1813_v6, %v1798_v11  ;;  %v1829_v57 = vadd.f32 %v1828_v41, %v1799_v60  ;;  %v1899_v40 = vsel %vm4595_vm14, 1, %v2958_v5  ;;  %vm1866_vm0 = vmand %vm1857_vm15, %vm1864_vm13  ;;  %v4613_v38 = vsel %vm4595_vm14, -inf, %v4330_v42 }
 0x142   :  { %v1908_v29 = vrot.slane %v1899_v40, %v3022_v15  ;;  %v1901_v31 = vcombine.high %v1899_v40, %v1899_v40  ;;  %v1900_v59 = vsel %vm1866_vm0, 1, %v2958_v5  ;;  %v4616_v33 = vsel %vm1866_vm0, -inf, %v4333_v16 }
 0x143   :  { %1830 = vst [vmem:[#allocation7 + $0x40] sm:$0xff] %v1814_v44  ;;  %1831 = vst [vmem:[#allocation7 + $0x48] sm:$0xff] %v1829_v57  ;;  %v1950_v35 = vcombine.high %v1900_v59, %v1900_v59  ;;  %v1957_v25 = vrot.slane %v1900_v59, %v3022_v15  ;;  %v2177_v14 = vmax.f32 %v4613_v38, %v4616_v33 }
 0x144   :  { %v1916_v2 = vcombine.high %v1908_v29, %v1908_v29  ;;  %v1915_v45 = vrot.slane %v1901_v31, %v3022_v15  ;;  %v1924_v46 = vrot.slane %v1908_v29, %v3022_v15 }
 0x145   :  { %v1964_v43 = vrot.slane %v1950_v35, %v3022_v15  ;;  %v1965_v13 = vcombine.high %v1957_v25, %v1957_v25  ;;  %v1973_v24 = vrot.slane %v1957_v25, %v3022_v15  ;;  %v2178_v29 = vrot.slane %v2177_v14, 4 }
 0x146   :  { %v1938_v32 = vrot.slane %v1916_v2, %v3022_v15  ;;  %v1917_v37 = vcombine.high %v1915_v45, %v1915_v45  ;;  %v1946_v49 = vcombine.high %v1924_v46, %v1924_v46  ;;  %vm1999_vm1 = vcmp.ne.s32.totalorder %v1924_v46, 0 }
 0x147   :  { %v1966_v7 = vcombine.high %v1964_v43, %v1964_v43  ;;  %v1931_v39 = vrot.slane %v1915_v45, %v3022_v15  ;;  %v1980_v42 = vrot.slane %v1964_v43, %v3022_v15  ;;  %v1987_v16 = vrot.slane %v1965_v13, %v3022_v15 }
 0x148   :  { %v1948_v27 = vcombine.high %v1938_v32, %v1938_v32  ;;  %vm2000_vm2 = vcmp.ne.s32.totalorder %v1938_v32, 0  ;;  %v1945_v56 = vrot.slane %v1917_v37, %v3022_v15  ;;  %vm2001_vm3 = vcmp.ne.s32.totalorder %v1946_v49, 0  ;;  %v4749_v37 = vld [vmem:[#allocation2] sm:$0x1] }
 0x149   :  { %v1947_v11 = vcombine.high %v1931_v39, %v1931_v39  ;;  %v2015_v60 = vsel %vm1999_vm1, 1, %v2958_v5  ;;  %v2016_v26 = vsel %vm2000_vm2, 1, %v2958_v5  ;;  %v1994_v41 = vrot.slane %v1966_v7, %v3022_v15 }
 0x14a   :  { %v1949_v6 = vcombine.high %v1945_v56, %v1945_v56  ;;  %v1995_v44 = vcombine.high %v1973_v24, %v1973_v24  ;;  %vm2002_vm4 = vcmp.ne.s32.totalorder %v1948_v27, 0  ;;  %v1996_v57 = vcombine.high %v1980_v42, %v1980_v42 }
 0x14b   :  { %v1997_v21 = vcombine.high %v1987_v16, %v1987_v16  ;;  %v2017_v40 = vsel %vm2001_vm3, 1, %v2958_v5  ;;  %v1998_v31 = vcombine.high %v1994_v41, %v1994_v41  ;;  %vm2003_vm5 = vcmp.ne.s32.totalorder %v1931_v39, 0 }
 0x14c   :  { %v2034_v59 = vrot.slane %v2015_v60, %v2993_v4  ;;  %v2038_v2 = vrot.slane %v2016_v26, %v2993_v4  ;;  %vm2004_vm6 = vcmp.ne.s32.totalorder %v1945_v56, 0  ;;  %vm4631_vm7 = vcmp.ne.s32.totalorder %v1947_v11, 0  ;;  %v5759_v56 = vld [vmem:[#allocation11_spill] sm:$0xff] }
 0x14d   :  { %vm2007_vm8 = vcmp.ne.s32.totalorder %v1973_v24, 0  ;;  %v2018_v45 = vsel %vm2002_vm4, 1, %v2958_v5  ;;  %vm2006_vm9 = vcmp.ne.s32.totalorder %v1949_v6, 0  ;;  %vm2008_vm10 = vcmp.ne.s32.totalorder %v1987_v16, 0  ;;  %v5762_v16 = vld [vmem:[#allocation14_spill] sm:$0xff] }
 0x14e   :  { %vm4636_vm11 = vcmp.ne.s32.totalorder %v1995_v44, 0  ;;  %v2042_v25 = vrot.slane %v2017_v40, %v2993_v4  ;;  %vm4641_vm12 = vcmp.ne.s32.totalorder %v1997_v21, 0  ;;  %vm2011_vm13 = vcmp.ne.s32.totalorder %v1980_v42, 0  ;;  %v5760_v40 = vld [vmem:[#allocation12_spill] sm:$0xff] }
 0x14f   :  { %vm2012_vm14 = vcmp.ne.s32.totalorder %v1994_v41, 0  ;;  %v2019_v43 = vsel %vm2003_vm5, 1, %v2958_v5  ;;  %vm4646_vm15 = vcmp.ne.s32.totalorder %v1996_v57, 0  ;;  %v2046_v49 = vrot.slane %v2018_v45, %v2993_v4 }
 0x150   :  { %vm4651_vm0 = vcmp.eq.s32.totalorder %v2034_v59, 1  ;;  %vm4655_vm1 = vcmp.eq.s32.totalorder %v2038_v2, 1  ;;  %vm4659_vm2 = vcmp.ne.s32.totalorder %v1998_v31, 0  ;;  %v2020_v39 = vsel %vm2004_vm6, 1, %v2958_v5  ;;  %v5761_v59 = vld [vmem:[#allocation13_spill] sm:$0xff] }
 0x151   :  { %v2021_v11 = vsel %vm4631_vm7, 1, %v2958_v5  ;;  %v2022_v60 = vsel %vm2006_vm9, 1, %v2958_v5  ;;  %v2023_v26 = vsel %vm2007_vm8, 1, %v2958_v5  ;;  %v2024_v6 = vsel %vm2008_vm10, 1, %v2958_v5 }
 0x152   :  { %v2050_v44 = vrot.slane %v2019_v43, %v2993_v4  ;;  %vm4674_vm3 = vcmp.eq.s32.totalorder %v2042_v25, 1  ;;  %v2111_v21 = vsel %vm4651_vm0, %v5759_v56, 0.0  ;;  %v2112_v31 = vsel %vm4651_vm0, %v5760_v40, 0.0  ;;  %v5765_v56 = vld [vmem:[#allocation15_spill] sm:$0xff] }
 0x153   :  { %v2113_v24 = vsel %vm4655_vm1, %v5761_v59, 0.0  ;;  %v2114_v2 = vsel %vm4655_vm1, %v5762_v16, 0.0  ;;  %v2025_v35 = vsel %vm4636_vm11, 1, %v2958_v5  ;;  %v4696_v45 = vsel %vm4641_vm12, 1, %v2958_v5 }
 0x154   :  { %v2054_v25 = vrot.slane %v2020_v39, %v2993_v4  ;;  %vm4699_vm4 = vcmp.eq.s32.totalorder %v2046_v49, 1  ;;  %v4705_v13 = vsel %vm2011_vm13, 1, %v2958_v5  ;;  %v2058_v27 = vrot.slane %v2021_v11, %v2993_v4 }
 0x155   :  { %v2115_v46 = vsel %vm4674_vm3, %v5765_v56, 0.0  ;;  %v2116_v32 = vsel %vm4674_vm3, %v4042_v55, 0.0  ;;  %vm4714_vm5 = vcmp.eq.s32.totalorder %v2050_v44, 1  ;;  %v2143_v49 = vadd.f32 %v2113_v24, %v2111_v21 }
 0x156   :  { %v2158_v40 = vadd.f32 %v2114_v2, %v2112_v31  ;;  %v2179_v59 = vmax.f32 %v2177_v14, %v2178_v29  ;;  %v4720_v42 = vsel %vm2012_vm14, 1, %v2958_v5  ;;  %v2062_v11 = vrot.slane %v2022_v60, %v2993_v4 }
 0x157   :  { %v2117_v16 = vsel %vm4699_vm4, %v4067_v20, 0.0  ;;  %v2118_v55 = vsel %vm4699_vm4, %v4069_v28, 0.0  ;;  %vm4729_vm6 = vcmp.eq.s32.totalorder %v2054_v25, 1  ;;  %v2144_v57 = vadd.f32 %v2143_v49, %v2115_v46 }
 0x158   :  { %v2159_v14 = vadd.f32 %v2158_v40, %v2116_v32  ;;  %v2180_v29 = vrot.slane %v2179_v59, 2  ;;  %v4736_v41 = vsel %vm4646_vm15, 1, %v2958_v5  ;;  %v2066_v60 = vrot.slane %v2023_v26, %v2993_v4 }
 0x159   :  { %v2119_v20 = vsel %vm4714_vm5, %v4097_v62, 0.0  ;;  %v2120_v28 = vsel %vm4714_vm5, %v4099_v58, 0.0  ;;  %vm4745_vm7 = vcmp.eq.s32.totalorder %v2058_v27, 1  ;;  %v2145_v31 = vadd.f32 %v2144_v57, %v2117_v16 }
 0x15a   :  { %v2160_v24 = vadd.f32 %v2159_v14, %v2118_v55  ;;  %v2181_v2 = vmax.f32 %v2179_v59, %v2180_v29  ;;  %vm2201_vm8 = vcmp.gt.s32.totalorder %v4749_v37, 6  ;;  %v4755_v26 = vsel %vm4659_vm2, 1, %v2958_v5 }
 0x15b   :  { %v2070_v62 = vrot.slane %v2024_v6, %v2993_v4  ;;  %v2121_v58 = vsel %vm4729_vm6, %v4117_v8, 0.0  ;;  %v2122_v25 = vsel %vm4729_vm6, %v4119_v10, 0.0  ;;  %vm4764_vm9 = vcmp.eq.s32.totalorder %v2062_v11, 1 }
 0x15c   :  { %v2146_v27 = vadd.f32 %v2145_v31, %v2119_v20  ;;  %v2161_v56 = vadd.f32 %v2160_v24, %v2120_v28  ;;  %v2182_v46 = vrot.slane %v2181_v2, 1  ;;  %v2074_v7 = vrot.slane %v2025_v35, %v2993_v4 }
 0x15d   :  { %v2078_v6 = vrot.slane %v4696_v45, %v2993_v4  ;;  %v2123_v8 = vsel %vm4745_vm7, %v4137_v23, 0.0  ;;  %v2124_v10 = vsel %vm4745_vm7, %v4139_v50, 0.0  ;;  %vm4777_vm10 = vcmp.eq.s32.totalorder %v2066_v60, 1 }
 0x15e   :  { %v2147_v39 = vadd.f32 %v2146_v27, %v2121_v58  ;;  %v2162_v49 = vadd.f32 %v2161_v56, %v2122_v25  ;;  %v2183_v40 = vmax.f32 %v2181_v2, %v2182_v46  ;;  %v2082_v35 = vrot.slane %v4705_v13, %v2993_v4 }
 0x15f   :  { %vm4783_vm11 = vcmp.eq.s32.totalorder %v2070_v62, 1  ;;  %v2125_v23 = vsel %vm4764_vm9, %v4159_v54, 0.0  ;;  %v2126_v50 = vsel %vm4764_vm9, %v4161_v19, 0.0  ;;  %v2127_v13 = vsel %vm4777_vm10, %v4177_v22, 0.0 }
 0x160   :  { %v2148_v59 = vadd.f32 %v2147_v39, %v2123_v8  ;;  %v2163_v11 = vadd.f32 %v2162_v49, %v2124_v10  ;;  %vm2184_vm12 = vcmp.eq.f32.partialorder %v4613_v38, %v2183_v40  ;;  %vm2185_vm13 = vcmp.eq.f32.partialorder %v4616_v33, %v2183_v40 }
 0x161   :  { %v2128_v16 = vsel %vm4777_vm10, %v4179_v18, 0.0  ;;  %v2186_v54 = vsel %vm2184_vm12, %v2985_v1, 16  ;;  %v2187_v55 = vsel %vm2185_vm13, %v2990_v3, 16  ;;  %vm4803_vm14 = vcmp.eq.s32.totalorder %v2074_v7, 1 }
 0x162   :  { %v2149_v44 = vadd.f32 %v2148_v59, %v2125_v23  ;;  %v2164_v57 = vadd.f32 %v2163_v11, %v2126_v50  ;;  %vm2188_vm15 = vcmp.lt.s32.totalorder %v2186_v54, %v2187_v55  ;;  %v2086_v14 = vrot.slane %v4720_v42, %v2993_v4 }
 0x163   :  { %v2129_v22 = vsel %vm4783_vm11, %v4197_v51, 0.0  ;;  %v2130_v18 = vsel %vm4783_vm11, %v4199_v30, 0.0  ;;  %v2189_v29 = vsel %vm2188_vm15, %v2186_v54, %v2187_v55  ;;  %vm4815_vm0 = vcmp.eq.s32.totalorder %v2078_v6, 1 }
 0x164   :  { %v2150_v20 = vadd.f32 %v2149_v44, %v2127_v13  ;;  %v2165_v28 = vadd.f32 %v2164_v57, %v2128_v16  ;;  %v2190_v21 = vrot.slane %v2189_v29, 4  ;;  %v2090_v31 = vrot.slane %v4736_v41, %v2993_v4 }
 0x165   :  { %v2131_v42 = vsel %vm4803_vm14, %v4211_v63, 0.0  ;;  %v2132_v51 = vsel %vm4803_vm14, %v4213_v0, 0.0  ;;  %v2202_v30 = vsel %vm2201_vm8, 1, %v2958_v5  ;;  %vm4830_vm1 = vcmp.eq.s32.totalorder %v2082_v35, 1 }
 0x166   :  { %v2151_v2 = vadd.f32 %v2150_v20, %v2129_v22  ;;  %v2166_v62 = vadd.f32 %v2165_v28, %v2130_v18  ;;  %vm2191_vm2 = vcmp.lt.s32.totalorder %v2189_v29, %v2190_v21  ;;  %v2094_v41 = vrot.slane %v4755_v26, %v2993_v4 }
 0x167   :  { %v2133_v63 = vsel %vm4815_vm0, %v4227_v61, 0.0  ;;  %v2134_v0 = vsel %vm4815_vm0, %v4229_v52, 0.0  ;;  %v2192_v58 = vsel %vm2191_vm2, %v2189_v29, %v2190_v21  ;;  %vm4842_vm3 = vcmp.eq.s32.totalorder %v2086_v14, 1 }
 0x168   :  { %v2152_v43 = vadd.f32 %v2151_v2, %v2131_v42  ;;  %v2167_v27 = vadd.f32 %v2166_v62, %v2132_v51  ;;  %v2193_v56 = vrot.slane %v2192_v58, 2  ;;  %v2135_v26 = vsel %vm4830_vm1, %v4246_v9, 0.0 }
 0x169   :  { %v2136_v61 = vsel %vm4830_vm1, %v4248_v34, 0.0  ;;  %vm4852_vm4 = vcmp.eq.s32.totalorder %v2090_v31, 1  ;;  %v2137_v6 = vsel %vm4842_vm3, %v4262_v17, 0.0  ;;  %v2138_v8 = vsel %vm4842_vm3, %v4264_v36, 0.0  ;;  %v4933_v34 = vld [vmem:[#allocation5] sm:$0xff] }
 0x16a   :  { %v2153_v52 = vadd.f32 %v2152_v43, %v2133_v63  ;;  %v2168_v7 = vadd.f32 %v2167_v27, %v2134_v0  ;;  %vm2194_vm5 = vcmp.lt.s32.totalorder %v2192_v58, %v2193_v56  ;;  %v2206_v10 = vrot.slane %v2202_v30, %v2993_v4 }
 0x16b   :  { %v2195_v9 = vsel %vm2194_vm5, %v2192_v58, %v2193_v56  ;;  %vm4863_vm6 = vcmp.eq.s32.totalorder %v2094_v41, 1  ;;  %v2139_v40 = vsel %vm4852_vm4, %v4276_v47, 0.0  ;;  %v2140_v17 = vsel %vm4852_vm4, %v4278_v48, 0.0  ;;  %v4973_v48 = vld [vmem:[#allocation5 + $0x28] sm:$0xff] }
 0x16c   :  { %v2154_v32 = vadd.f32 %v2153_v52, %v2135_v26  ;;  %v2169_v39 = vadd.f32 %v2168_v7, %v2136_v61  ;;  %v2196_v49 = vrot.slane %v2195_v9, 1  ;;  %v2141_v45 = vsel %vm4863_vm6, %v4291_v12, 0.0 }
 0x16d   :  { %v2142_v23 = vsel %vm4863_vm6, %v4293_v53, 0.0  ;;  %vm2207_vm9 = vcmp.eq.s32.totalorder %v2206_v10, 1 }
 0x16e   :  { %v2155_v35 = vadd.f32 %v2154_v32, %v2137_v6  ;;  %v2170_v36 = vadd.f32 %v2169_v39, %v2138_v8  ;;  %vm2197_vm7 = vcmp.lt.s32.totalorder %v2195_v9, %v2196_v49 }
 0x16f   :  { %v2198_v50 = vsel %vm2197_vm7, %v2195_v9, %v2196_v49  ;;  %v4940_v49 = vld [vmem:[#allocation5 + $0x8] sm:$0xff]  ;;  %v5068_v9 = vld [vmem:[#allocation5 + $0x60] sm:$0xff] }
 0x170   :  { %v2156_v59 = vadd.f32 %v2155_v35, %v2139_v40  ;;  %v2171_v11 = vadd.f32 %v2170_v36, %v2140_v17  ;;  %vm2199_vm8 = vcmp.eq.s32.totalorder %v2985_v1, %v2198_v50  ;;  %vm2200_vm11 = vcmp.eq.s32.totalorder %v2990_v3, %v2198_v50  ;;  %v4942_v40 = vld [vmem:[#allocation5 + $0x10] sm:$0xff]  ;;  %v4944_v17 = vld [vmem:[#allocation5 + $0x18] sm:$0xff] }
 0x171   :  { %vm4880_vm10 = vmand %vm2199_vm8, %vm2207_vm9 }
 0x172   :  { %v2157_v47 = vadd.f32 %v2156_v59, %v2141_v45  ;;  %v2172_v13 = vadd.f32 %v2171_v11, %v2142_v23  ;;  %v2242_v12 = vsel %vm4880_vm10, 1, %v2958_v5  ;;  %vm2209_vm12 = vmand %vm2200_vm11, %vm2207_vm9  ;;  %v4898_v20 = vsel %vm4880_vm10, -inf, %v4613_v38 }
 0x173   :  { %v2251_v53 = vrot.slane %v2242_v12, %v3022_v15  ;;  %v2244_v16 = vcombine.high %v2242_v12, %v2242_v12  ;;  %v2243_v54 = vsel %vm2209_vm12, 1, %v2958_v5  ;;  %v4901_v28 = vsel %vm2209_vm12, -inf, %v4616_v33 }
 0x174   :  { %2173 = vst [vmem:[#allocation7 + $0x50] sm:$0xff] %v2157_v47  ;;  %2174 = vst [vmem:[#allocation7 + $0x58] sm:$0xff] %v2172_v13  ;;  %v2293_v19 = vcombine.high %v2243_v54, %v2243_v54  ;;  %v2300_v14 = vrot.slane %v2243_v54, %v3022_v15  ;;  %v4906_v30 = vmax.f32 %v4898_v20, %v4901_v28  ;;  %v4971_v13 = vld [vmem:[#allocation5 + $0x20] sm:$0xff] }
 0x175   :  { %v2259_v55 = vcombine.high %v2251_v53, %v2251_v53  ;;  %v2258_v44 = vrot.slane %v2244_v16, %v3022_v15  ;;  %v2267_v57 = vrot.slane %v2251_v53, %v3022_v15 }
 0x176   :  { %v2307_v18 = vrot.slane %v2293_v19, %v3022_v15  ;;  %v2308_v21 = vcombine.high %v2300_v14, %v2300_v14  ;;  %v2316_v2 = vrot.slane %v2300_v14, %v3022_v15  ;;  %v2521_v26 = vrot.slane %v4906_v30, 4  ;;  %v4998_v14 = vld [vmem:[#allocation5 + $0x30] sm:$0xff] }
 0x177   :  { %v2281_v22 = vrot.slane %v2259_v55, %v3022_v15  ;;  %v2260_v29 = vcombine.high %v2258_v44, %v2258_v44  ;;  %v2289_v60 = vcombine.high %v2267_v57, %v2267_v57  ;;  %vm2342_vm13 = vcmp.ne.s32.totalorder %v2267_v57, 0 }
 0x178   :  { %v2309_v42 = vcombine.high %v2307_v18, %v2307_v18  ;;  %v2274_v51 = vrot.slane %v2258_v44, %v3022_v15  ;;  %v2323_v38 = vrot.slane %v2307_v18, %v3022_v15  ;;  %v2330_v62 = vrot.slane %v2308_v21, %v3022_v15  ;;  %v5110_v21 = vld [vmem:[#allocation5 + $0x88] sm:$0xff] }
 0x179   :  { %v2291_v31 = vcombine.high %v2281_v22, %v2281_v22  ;;  %vm2343_vm14 = vcmp.ne.s32.totalorder %v2281_v22, 0  ;;  %v2288_v24 = vrot.slane %v2260_v29, %v3022_v15  ;;  %vm2344_vm15 = vcmp.ne.s32.totalorder %v2289_v60, 0  ;;  %v5000_v22 = vld [vmem:[#allocation5 + $0x38] sm:$0xff] }
 0x17a   :  { %v2290_v33 = vcombine.high %v2274_v51, %v2274_v51  ;;  %v2358_v41 = vsel %vm2342_vm13, 1, %v2958_v5  ;;  %v2359_v63 = vsel %vm2343_vm14, 1, %v2958_v5  ;;  %v2337_v58 = vrot.slane %v2309_v42, %v3022_v15 }
 0x17b   :  { %v2292_v0 = vcombine.high %v2288_v24, %v2288_v24  ;;  %v2338_v25 = vcombine.high %v2316_v2, %v2316_v2  ;;  %vm2345_vm0 = vcmp.ne.s32.totalorder %v2291_v31, 0  ;;  %v2339_v43 = vcombine.high %v2323_v38, %v2323_v38 }
 0x17c   :  { %v2340_v27 = vcombine.high %v2330_v62, %v2330_v62  ;;  %v2360_v56 = vsel %vm2344_vm15, 1, %v2958_v5  ;;  %v2341_v61 = vcombine.high %v2337_v58, %v2337_v58  ;;  %vm2346_vm1 = vcmp.ne.s32.totalorder %v2274_v51, 0 }
 0x17d   :  { %v2377_v46 = vrot.slane %v2358_v41, %v2993_v4  ;;  %v2381_v52 = vrot.slane %v2359_v63, %v2993_v4  ;;  %vm2347_vm2 = vcmp.ne.s32.totalorder %v2288_v24, 0  ;;  %vm4919_vm3 = vcmp.ne.s32.totalorder %v2290_v33, 0  ;;  %v5030_v33 = vld [vmem:[#allocation5 + $0x48] sm:$0xff] }
 0x17e   :  { %vm2350_vm4 = vcmp.ne.s32.totalorder %v2316_v2, 0  ;;  %v2361_v6 = vsel %vm2345_vm0, 1, %v2958_v5  ;;  %vm4924_vm5 = vcmp.ne.s32.totalorder %v2292_v0, 0  ;;  %vm2351_vm6 = vcmp.ne.s32.totalorder %v2330_v62, 0  ;;  %v5028_v2 = vld [vmem:[#allocation5 + $0x40] sm:$0xff]  ;;  %v5193_v62 = vld [vmem:[#allocation5 + $0xd0] sm:$0xff] }
 0x17f   :  { %vm4928_vm7 = vcmp.ne.s32.totalorder %v2338_v25, 0  ;;  %v2385_v10 = vrot.slane %v2360_v56, %v2993_v4  ;;  %vm4935_vm8 = vcmp.ne.s32.totalorder %v2340_v27, 0  ;;  %vm2354_vm9 = vcmp.ne.s32.totalorder %v2323_v38, 0  ;;  %v5048_v56 = vld [vmem:[#allocation5 + $0x50] sm:$0xff] }
 0x180   :  { %vm2355_vm10 = vcmp.ne.s32.totalorder %v2337_v58, 0  ;;  %v2362_v39 = vsel %vm2346_vm1, 1, %v2958_v5  ;;  %vm4946_vm11 = vcmp.ne.s32.totalorder %v2339_v43, 0  ;;  %v2389_v36 = vrot.slane %v2361_v6, %v2993_v4 }
 0x181   :  { %vm4951_vm12 = vcmp.eq.s32.totalorder %v2377_v46, 1  ;;  %vm4955_vm13 = vcmp.eq.s32.totalorder %v2381_v52, 1  ;;  %vm4959_vm14 = vcmp.ne.s32.totalorder %v2341_v61, 0  ;;  %v2363_v59 = vsel %vm2347_vm2, 1, %v2958_v5  ;;  %v5050_v61 = vld [vmem:[#allocation5 + $0x58] sm:$0xff] }
 0x182   :  { %v2364_v11 = vsel %vm4919_vm3, 1, %v2958_v5  ;;  %v2365_v47 = vsel %vm4924_vm5, 1, %v2958_v5  ;;  %v2366_v12 = vsel %vm2350_vm4, 1, %v2958_v5  ;;  %v4979_v53 = vsel %vm2351_vm6, 1, %v2958_v5 }
 0x183   :  { %v2393_v16 = vrot.slane %v2362_v39, %v2993_v4  ;;  %vm4982_vm15 = vcmp.eq.s32.totalorder %v2385_v10, 1  ;;  %v2454_v55 = vsel %vm4951_vm12, %v4933_v34, 0.0  ;;  %v2455_v19 = vsel %vm4951_vm12, %v4940_v49, 0.0  ;;  %v5070_v10 = vld [vmem:[#allocation5 + $0x68] sm:$0xff] }
 0x184   :  { %v2456_v44 = vsel %vm4955_vm13, %v4942_v40, 0.0  ;;  %v2457_v57 = vsel %vm4955_vm13, %v4944_v17, 0.0  ;;  %v5005_v18 = vsel %vm4928_vm7, 1, %v2958_v5  ;;  %v5010_v29 = vsel %vm4935_vm8, 1, %v2958_v5 }
 0x185   :  { %v2397_v60 = vrot.slane %v2363_v59, %v2993_v4  ;;  %vm5013_vm0 = vcmp.eq.s32.totalorder %v2389_v36, 1  ;;  %v5019_v31 = vsel %vm2354_vm9, 1, %v2958_v5  ;;  %v2401_v42 = vrot.slane %v2364_v11, %v2993_v4 }
 0x186   :  { %v2458_v51 = vsel %vm4982_vm15, %v4971_v13, 0.0  ;;  %v2459_v24 = vsel %vm4982_vm15, %v4973_v48, 0.0  ;;  %vm5032_vm1 = vcmp.eq.s32.totalorder %v2393_v16, 1  ;;  %v2486_v38 = vadd.f32 %v2456_v44, %v2454_v55 }
 0x187   :  { %v2501_v41 = vadd.f32 %v2457_v57, %v2455_v19  ;;  %v2522_v63 = vmax.f32 %v4906_v30, %v2521_v26  ;;  %v5039_v0 = vsel %vm2355_vm10, 1, %v2958_v5  ;;  %v2405_v25 = vrot.slane %v2365_v47, %v2993_v4  ;;  %v5090_v47 = vld [vmem:[#allocation5 + $0x70] sm:$0xff] }
 0x188   :  { %v2460_v43 = vsel %vm5013_vm0, %v4998_v14, 0.0  ;;  %v2461_v27 = vsel %vm5013_vm0, %v5000_v22, 0.0  ;;  %vm5052_vm2 = vcmp.eq.s32.totalorder %v2397_v60, 1  ;;  %v2487_v58 = vadd.f32 %v2486_v38, %v2458_v51  ;;  %v5108_v60 = vld [vmem:[#allocation5 + $0x80] sm:$0xff] }
 0x189   :  { %v2502_v26 = vadd.f32 %v2501_v41, %v2459_v24  ;;  %v2523_v46 = vrot.slane %v2522_v63, 2  ;;  %v5059_v52 = vsel %vm4946_vm11, 1, %v2958_v5  ;;  %v2409_v7 = vrot.slane %v2366_v12, %v2993_v4  ;;  %v5092_v12 = vld [vmem:[#allocation5 + $0x78] sm:$0xff] }
 0x18a   :  { %v2462_v6 = vsel %vm5032_vm1, %v5028_v2, 0.0  ;;  %v2463_v8 = vsel %vm5032_vm1, %v5030_v33, 0.0  ;;  %vm5072_vm3 = vcmp.eq.s32.totalorder %v2401_v42, 1  ;;  %v2488_v39 = vadd.f32 %v2487_v58, %v2460_v43 }
 0x18b   :  { %v2503_v35 = vadd.f32 %v2502_v26, %v2461_v27  ;;  %v2524_v36 = vmax.f32 %v2522_v63, %v2523_v46  ;;  %vm2544_vm4 = vcmp.gt.s32.totalorder %v4749_v37, 7  ;;  %v5080_v45 = vsel %vm4959_vm14, 1, %v2958_v5  ;;  %v5128_v63 = vld [vmem:[#allocation5 + $0x90] sm:$0xff]  ;;  %v5142_v46 = vld [vmem:[#allocation5 + $0xa0] sm:$0xff] }
 0x18c   :  { %v2413_v23 = vrot.slane %v4979_v53, %v2993_v4  ;;  %v2464_v59 = vsel %vm5052_vm2, %v5048_v56, 0.0  ;;  %v2465_v11 = vsel %vm5052_vm2, %v5050_v61, 0.0  ;;  %vm5094_vm5 = vcmp.eq.s32.totalorder %v2405_v25, 1  ;;  %v5130_v25 = vld [vmem:[#allocation5 + $0x98] sm:$0xff] }
 0x18d   :  { %v2489_v50 = vadd.f32 %v2488_v39, %v2462_v6  ;;  %v2504_v54 = vadd.f32 %v2503_v35, %v2463_v8  ;;  %v2525_v55 = vrot.slane %v2524_v36, 1  ;;  %v2417_v53 = vrot.slane %v5005_v18, %v2993_v4 }
 0x18e   :  { %v2421_v19 = vrot.slane %v5010_v29, %v2993_v4  ;;  %v2466_v44 = vsel %vm5072_vm3, %v5068_v9, 0.0  ;;  %v2467_v57 = vsel %vm5072_vm3, %v5070_v10, 0.0  ;;  %vm5112_vm6 = vcmp.eq.s32.totalorder %v2409_v7, 1  ;;  %v5144_v7 = vld [vmem:[#allocation5 + $0xa8] sm:$0xff] }
 0x18f   :  { %v2490_v18 = vadd.f32 %v2489_v50, %v2464_v59  ;;  %v2505_v51 = vadd.f32 %v2504_v54, %v2465_v11  ;;  %v2526_v24 = vmax.f32 %v2524_v36, %v2525_v55  ;;  %v2425_v29 = vrot.slane %v5019_v31, %v2993_v4  ;;  %v5158_v36 = vld [vmem:[#allocation5 + $0xb0] sm:$0xff]  ;;  %v5224_v59 = vld [vmem:[#allocation5 + $0xf8] sm:$0xff] }
 0x190   :  { %vm5118_vm7 = vcmp.eq.s32.totalorder %v2413_v23, 1  ;;  %v2468_v38 = vsel %vm5094_vm5, %v5090_v47, 0.0  ;;  %v2469_v41 = vsel %vm5094_vm5, %v5092_v12, 0.0  ;;  %v2470_v31 = vsel %vm5112_vm6, %v5108_v60, 0.0  ;;  %v5160_v23 = vld [vmem:[#allocation5 + $0xb8] sm:$0xff] }
 0x191   :  { %v2491_v43 = vadd.f32 %v2490_v18, %v2466_v44  ;;  %v2506_v27 = vadd.f32 %v2505_v51, %v2467_v57  ;;  %vm2527_vm8 = vcmp.eq.f32.partialorder %v4898_v20, %v2526_v24  ;;  %vm2528_vm9 = vcmp.eq.f32.partialorder %v4901_v28, %v2526_v24  ;;  %v5179_v44 = vld [vmem:[#allocation5 + $0xc8] sm:$0xff] }
 0x192   :  { %v2471_v30 = vsel %vm5112_vm6, %v5110_v21, 0.0  ;;  %v2529_v58 = vsel %vm2527_vm8, %v2985_v1, 16  ;;  %v2530_v26 = vsel %vm2528_vm9, %v2990_v3, 16  ;;  %vm5146_vm10 = vcmp.eq.s32.totalorder %v2417_v53, 1 }
 0x193   :  { %v2492_v28 = vadd.f32 %v2491_v43, %v2468_v38  ;;  %v2507_v6 = vadd.f32 %v2506_v27, %v2469_v41  ;;  %vm2531_vm11 = vcmp.lt.s32.totalorder %v2529_v58, %v2530_v26  ;;  %v2429_v8 = vrot.slane %v5039_v0, %v2993_v4 }
 0x194   :  { %v2472_v32 = vsel %vm5118_vm7, %v5128_v63, 0.0  ;;  %v2473_v39 = vsel %vm5118_vm7, %v5130_v25, 0.0  ;;  %v2532_v35 = vsel %vm2531_vm11, %v2529_v58, %v2530_v26  ;;  %vm5162_vm12 = vcmp.eq.s32.totalorder %v2421_v19, 1  ;;  %v5177_v19 = vld [vmem:[#allocation5 + $0xc0] sm:$0xff]  ;;  %v5210_v26 = vld [vmem:[#allocation5 + $0xe8] sm:$0xff] }
 0x195   :  { %v2493_v11 = vadd.f32 %v2492_v28, %v2470_v31  ;;  %v2508_v16 = vadd.f32 %v2507_v6, %v2471_v30  ;;  %v2533_v0 = vrot.slane %v2532_v35, 4  ;;  %v2433_v50 = vrot.slane %v5059_v52, %v2993_v4  ;;  %v5208_v58 = vld [vmem:[#allocation5 + $0xe0] sm:$0xff] }
 0x196   :  { %v2474_v54 = vsel %vm5146_vm10, %v5142_v46, 0.0  ;;  %v2475_v55 = vsel %vm5146_vm10, %v5144_v7, 0.0  ;;  %v2545_v53 = vsel %vm2544_vm4, 1, %v2958_v5  ;;  %vm5181_vm13 = vcmp.eq.s32.totalorder %v2425_v29, 1  ;;  %v5195_v29 = vld [vmem:[#allocation5 + $0xd8] sm:$0xff] }
 0x197   :  { %v2494_v52 = vadd.f32 %v2493_v11, %v2472_v32  ;;  %v2509_v42 = vadd.f32 %v2508_v16, %v2473_v39  ;;  %vm2534_vm14 = vcmp.lt.s32.totalorder %v2532_v35, %v2533_v0  ;;  %v2437_v18 = vrot.slane %v5080_v45, %v2993_v4 }
 0x198   :  { %v2476_v51 = vsel %vm5162_vm12, %v5158_v36, 0.0  ;;  %v2477_v37 = vsel %vm5162_vm12, %v5160_v23, 0.0  ;;  %v2535_v24 = vsel %vm2534_vm14, %v2532_v35, %v2533_v0  ;;  %vm5197_vm15 = vcmp.eq.s32.totalorder %v2429_v8, 1  ;;  %v5222_v35 = vld [vmem:[#allocation5 + $0xf0] sm:$0xff] }
 0x199   :  { %v2495_v41 = vadd.f32 %v2494_v52, %v2474_v54  ;;  %v2510_v43 = vadd.f32 %v2509_v42, %v2475_v55  ;;  %v2536_v45 = vrot.slane %v2535_v24, 2  ;;  %v2478_v27 = vsel %vm5181_vm13, %v5177_v19, 0.0 }
 0x19a   :  { %v2479_v31 = vsel %vm5181_vm13, %v5179_v44, 0.0  ;;  %v2549_v30 = vrot.slane %v2545_v53, %v2993_v4  ;;  %vm5212_vm0 = vcmp.eq.s32.totalorder %v2433_v50, 1  ;;  %v2480_v8 = vsel %vm5197_vm15, %v5193_v62, 0.0 }
 0x19b   :  { %v2496_v28 = vadd.f32 %v2495_v41, %v2476_v51  ;;  %v2511_v6 = vadd.f32 %v2510_v43, %v2477_v37  ;;  %vm2537_vm1 = vcmp.lt.s32.totalorder %v2535_v24, %v2536_v45  ;;  %v2481_v32 = vsel %vm5197_vm15, %v5195_v29, 0.0 }
 0x19c   :  { %v2538_v39 = vsel %vm2537_vm1, %v2535_v24, %v2536_v45  ;;  %vm5226_vm2 = vcmp.eq.s32.totalorder %v2437_v18, 1  ;;  %v2482_v54 = vsel %vm5212_vm0, %v5208_v58, 0.0  ;;  %v2483_v55 = vsel %vm5212_vm0, %v5210_v26, 0.0 }
 0x19d   :  { %v2497_v16 = vadd.f32 %v2496_v28, %v2478_v27  ;;  %v2512_v0 = vadd.f32 %v2511_v6, %v2479_v31  ;;  %v2539_v50 = vrot.slane %v2538_v39, 1  ;;  %vm5236_vm4 = vcmp.eq.s32.totalorder %v2549_v30, 1 }
 0x19e   :  { %v2484_v42 = vsel %vm5226_vm2, %v5222_v35, 0.0  ;;  %v2485_v18 = vsel %vm5226_vm2, %v5224_v59, 0.0 }
 0x19f   :  { %v2498_v53 = vadd.f32 %v2497_v16, %v2480_v8  ;;  %v2513_v57 = vadd.f32 %v2512_v0, %v2481_v32  ;;  %vm2540_vm3 = vcmp.lt.s32.totalorder %v2538_v39, %v2539_v50 }
 0x1a0   :  { %v2541_v51 = vsel %vm2540_vm3, %v2538_v39, %v2539_v50 }
 0x1a1   :  { %v2499_v37 = vadd.f32 %v2498_v53, %v2482_v54  ;;  %v2514_v24 = vadd.f32 %v2513_v57, %v2483_v55  ;;  %vm2542_vm5 = vcmp.eq.s32.totalorder %v2985_v1, %v2541_v51  ;;  %vm2543_vm7 = vcmp.eq.s32.totalorder %v2990_v3, %v2541_v51 }
 0x1a2   :  { %vm2551_vm6 = vmand %vm2542_vm5, %vm5236_vm4 }
 0x1a3   :  { %v2500_v38 = vadd.f32 %v2499_v37, %v2484_v42  ;;  %v2515_v41 = vadd.f32 %v2514_v24, %v2485_v18  ;;  %v2585_v43 = vsel %vm2551_vm6, 1, %v2958_v5  ;;  %vm2552_vm8 = vmand %vm2543_vm7, %vm5236_vm4 }
 0x1a4   :  { %v2594_v45 = vrot.slane %v2585_v43, %v3022_v15  ;;  %v2587_v27 = vcombine.high %v2585_v43, %v2585_v43  ;;  %v2586_v28 = vsel %vm2552_vm8, 1, %v2958_v5 }
 0x1a5   :  { %2516 = vst [vmem:[#allocation7 + $0x60] sm:$0xff] %v2500_v38  ;;  %2517 = vst [vmem:[#allocation7 + $0x68] sm:$0xff] %v2515_v41  ;;  %v2636_v8 = vcombine.high %v2586_v28, %v2586_v28  ;;  %v2643_v3 = vrot.slane %v2586_v28, %v3022_v15 }
 0x1a6   :  { %v2602_v31 = vcombine.high %v2594_v45, %v2594_v45  ;;  %v2610_v30 = vrot.slane %v2594_v45, %v3022_v15  ;;  %v2601_v1 = vrot.slane %v2587_v27, %v3022_v15 }
 0x1a7   :  { %v2650_v16 = vrot.slane %v2636_v8, %v3022_v15  ;;  %v2651_v53 = vcombine.high %v2643_v3, %v2643_v3  ;;  %v2659_v24 = vrot.slane %v2643_v3, %v3022_v15 }
 0x1a8   :  { %v2624_v20 = vrot.slane %v2602_v31, %v3022_v15  ;;  %v2632_v6 = vcombine.high %v2610_v30, %v2610_v30  ;;  %v2603_v32 = vcombine.high %v2601_v1, %v2601_v1  ;;  %vm2685_vm9 = vcmp.ne.s32.totalorder %v2610_v30, 0 }
 0x1a9   :  { %v2617_v11 = vrot.slane %v2601_v1, %v3022_v15  ;;  %v2701_v0 = vsel %vm2685_vm9, 1, %v2958_v5  ;;  %v2652_v18 = vcombine.high %v2650_v16, %v2650_v16  ;;  %v5271_v41 = vrot.slane %v2650_v16, %v3022_v15 }
 0x1aa   :  { %v2634_v39 = vcombine.high %v2624_v20, %v2624_v20  ;;  %vm2686_vm10 = vcmp.ne.s32.totalorder %v2624_v20, 0  ;;  %vm2687_vm11 = vcmp.ne.s32.totalorder %v2632_v6, 0  ;;  %v2631_v54 = vrot.slane %v2603_v32, %v3022_v15 }
 0x1ab   :  { %v2702_v50 = vsel %vm2686_vm10, 1, %v2958_v5  ;;  %v2633_v55 = vcombine.high %v2617_v11, %v2617_v11  ;;  %v2703_v57 = vsel %vm2687_vm11, 1, %v2958_v5  ;;  %vm2689_vm13 = vcmp.ne.s32.totalorder %v2617_v11, 0 }
 0x1ac   :  { %vm2688_vm12 = vcmp.ne.s32.totalorder %v2634_v39, 0  ;;  %v2720_v52 = vrot.slane %v2701_v0, %v2993_v4  ;;  %v2724_v42 = vrot.slane %v2702_v50, %v2993_v4  ;;  %v2635_v37 = vcombine.high %v2631_v54, %v2631_v54 }
 0x1ad   :  { %v2704_v51 = vsel %vm2688_vm12, 1, %v2958_v5  ;;  %vm2690_vm14 = vcmp.ne.s32.totalorder %v2631_v54, 0  ;;  %v2728_v38 = vrot.slane %v2703_v57, %v2993_v4  ;;  %v2673_v43 = vrot.slane %v2651_v53, %v3022_v15 }
 0x1ae   :  { %vm2691_vm15 = vcmp.ne.s32.totalorder %v2633_v55, 0  ;;  %v2705_v45 = vsel %vm2689_vm13, 1, %v2958_v5  ;;  %v2681_v27 = vcombine.high %v2659_v24, %v2659_v24  ;;  %v2732_v31 = vrot.slane %v2704_v51, %v2993_v4 }
 0x1af   :  { %vm5276_vm0 = vcmp.eq.s32.totalorder %v2720_v52, 1  ;;  %vm5280_vm1 = vcmp.eq.s32.totalorder %v2724_v42, 1  ;;  %v5285_v20 = vrot.slane %v2652_v18, %v3022_v15  ;;  %v2682_v28 = vcombine.high %v5271_v41, %v5271_v41 }
 0x1b0   :  { %v2683_v6 = vcombine.high %v2673_v43, %v2673_v43  ;;  %v2706_v8 = vsel %vm2690_vm14, 1, %v2958_v5  ;;  %vm2692_vm2 = vcmp.ne.s32.totalorder %v2635_v37, 0  ;;  %v2707_v32 = vsel %vm2691_vm15, 1, %v2958_v5 }
 0x1b1   :  { %v2736_v39 = vrot.slane %v2705_v45, %v2993_v4  ;;  %vm5292_vm3 = vcmp.eq.s32.totalorder %v2728_v38, 1  ;;  %v2797_v15 = vsel %vm5276_vm0, %v4933_v34, 0.0  ;;  %v2798_v11 = vsel %vm5276_vm0, %v4940_v49, 0.0 }
 0x1b2   :  { %v2799_v16 = vsel %vm5280_vm1, %v4942_v40, 0.0  ;;  %v2800_v0 = vsel %vm5280_vm1, %v4944_v17, 0.0  ;;  %v2684_v50 = vcombine.high %v5285_v20, %v5285_v20  ;;  %vm2693_vm4 = vcmp.ne.s32.totalorder %v2659_v24, 0 }
 0x1b3   :  { %v2740_v54 = vrot.slane %v2706_v8, %v2993_v4  ;;  %vm5311_vm5 = vcmp.eq.s32.totalorder %v2732_v31, 1  ;;  %vm2694_vm6 = vcmp.ne.s32.totalorder %v2673_v43, 0  ;;  %v2708_v49 = vsel %vm2692_vm2, 1, %v2958_v5 }
 0x1b4   :  { %v2801_v40 = vsel %vm5292_vm3, %v4971_v13, 0.0  ;;  %v2802_v17 = vsel %vm5292_vm3, %v4973_v48, 0.0  ;;  %v2744_v55 = vrot.slane %v2707_v32, %v2993_v4  ;;  %vm5323_vm7 = vcmp.eq.s32.totalorder %v2736_v39, 1 }
 0x1b5   :  { %v2829_v57 = vadd.f32 %v2799_v16, %v2797_v15  ;;  %v2844_v52 = vadd.f32 %v2800_v0, %v2798_v11  ;;  %vm5327_vm8 = vcmp.ne.s32.totalorder %v2681_v27, 0  ;;  %v2709_v18 = vsel %vm2693_vm4, 1, %v2958_v5 }
 0x1b6   :  { %v2803_v13 = vsel %vm5311_vm5, %v4998_v14, 0.0  ;;  %v2804_v48 = vsel %vm5311_vm5, %v5000_v22, 0.0  ;;  %v2748_v51 = vrot.slane %v2708_v49, %v2993_v4  ;;  %vm5339_vm9 = vcmp.eq.s32.totalorder %v2740_v54, 1 }
 0x1b7   :  { %v2830_v24 = vadd.f32 %v2829_v57, %v2801_v40  ;;  %v2845_v38 = vadd.f32 %v2844_v52, %v2802_v17  ;;  %vm5343_vm10 = vcmp.ne.s32.totalorder %v2683_v6, 0  ;;  %v2710_v27 = vsel %vm2694_vm6, 1, %v2958_v5 }
 0x1b8   :  { %v2805_v14 = vsel %vm5323_vm7, %v5028_v2, 0.0  ;;  %v2806_v22 = vsel %vm5323_vm7, %v5030_v33, 0.0  ;;  %v2752_v31 = vrot.slane %v2709_v18, %v2993_v4  ;;  %vm5356_vm11 = vcmp.eq.s32.totalorder %v2744_v55, 1 }
 0x1b9   :  { %v2831_v1 = vadd.f32 %v2830_v24, %v2803_v13  ;;  %v2846_v6 = vadd.f32 %v2845_v38, %v2804_v48  ;;  %vm2697_vm12 = vcmp.ne.s32.totalorder %v5271_v41, 0  ;;  %v2711_v43 = vsel %vm5327_vm8, 1, %v2958_v5 }
 0x1ba   :  { %v2807_v2 = vsel %vm5339_vm9, %v5048_v56, 0.0  ;;  %v2808_v33 = vsel %vm5339_vm9, %v5050_v61, 0.0  ;;  %v2756_v8 = vrot.slane %v2710_v27, %v2993_v4  ;;  %vm5371_vm13 = vcmp.eq.s32.totalorder %v2748_v51, 1 }
 0x1bb   :  { %v2832_v39 = vadd.f32 %v2831_v1, %v2805_v14  ;;  %v2847_v3 = vadd.f32 %v2846_v6, %v2806_v22  ;;  %vm2698_vm14 = vcmp.ne.s32.totalorder %v5285_v20, 0  ;;  %v2712_v15 = vsel %vm5343_vm10, 1, %v2958_v5 }
 0x1bc   :  { %v2809_v56 = vsel %vm5356_vm11, %v5068_v9, 0.0  ;;  %v2810_v61 = vsel %vm5356_vm11, %v5070_v10, 0.0  ;;  %v2760_v11 = vrot.slane %v2711_v43, %v2993_v4  ;;  %vm5386_vm15 = vcmp.eq.s32.totalorder %v2752_v31, 1 }
 0x1bd   :  { %v2833_v0 = vadd.f32 %v2832_v39, %v2807_v2  ;;  %v2848_v54 = vadd.f32 %v2847_v3, %v2808_v33  ;;  %vm5390_vm0 = vcmp.ne.s32.totalorder %v2682_v28, 0  ;;  %v2713_v9 = vsel %vm2697_vm12, 1, %v2958_v5 }
 0x1be   :  { %v2811_v10 = vsel %vm5371_vm13, %v5090_v47, 0.0  ;;  %v2812_v49 = vsel %vm5371_vm13, %v5092_v12, 0.0  ;;  %v2764_v40 = vrot.slane %v2712_v15, %v2993_v4  ;;  %vm5404_vm1 = vcmp.eq.s32.totalorder %v2756_v8, 1 }
 0x1bf   :  { %v2834_v28 = vadd.f32 %v2833_v0, %v2809_v56  ;;  %v2849_v55 = vadd.f32 %v2848_v54, %v2810_v61  ;;  %vm2700_vm2 = vcmp.ne.s32.totalorder %v2684_v50, 0  ;;  %v2714_v41 = vsel %vm2698_vm14, 1, %v2958_v5 }
 0x1c0   :  { %v2813_v47 = vsel %vm5386_vm15, %v5108_v60, 0.0  ;;  %v2814_v12 = vsel %vm5386_vm15, %v5110_v21, 0.0  ;;  %v2768_v53 = vrot.slane %v2713_v9, %v2993_v4  ;;  %vm5418_vm3 = vcmp.eq.s32.totalorder %v2760_v11, 1 }
 0x1c1   :  { %v2835_v52 = vadd.f32 %v2834_v28, %v2811_v10  ;;  %v2850_v50 = vadd.f32 %v2849_v55, %v2812_v49  ;;  %v2715_v20 = vsel %vm5390_vm0, 1, %v2958_v5  ;;  %v2815_v60 = vsel %vm5404_vm1, %v5128_v63, 0.0 }
 0x1c2   :  { %v2816_v21 = vsel %vm5404_vm1, %v5130_v25, 0.0  ;;  %v2772_v42 = vrot.slane %v2714_v41, %v2993_v4  ;;  %vm5432_vm4 = vcmp.eq.s32.totalorder %v2764_v40, 1  ;;  %v2716_v51 = vsel %vm2700_vm2, 1, %v2958_v5 }
 0x1c3   :  { %v2836_v13 = vadd.f32 %v2835_v52, %v2813_v47  ;;  %v2851_v48 = vadd.f32 %v2850_v50, %v2814_v12  ;;  %v2817_v37 = vsel %vm5418_vm3, %v5142_v46, 0.0  ;;  %v2818_v63 = vsel %vm5418_vm3, %v5144_v7, 0.0 }
 0x1c4   :  { %v2776_v25 = vrot.slane %v2715_v20, %v2993_v4  ;;  %vm5444_vm5 = vcmp.eq.s32.totalorder %v2768_v53, 1  ;;  %v2819_v5 = vsel %vm5432_vm4, %v5158_v36, 0.0  ;;  %v2820_v46 = vsel %vm5432_vm4, %v5160_v23, 0.0 }
 0x1c5   :  { %v2837_v38 = vadd.f32 %v2836_v13, %v2815_v60  ;;  %v2852_v45 = vadd.f32 %v2851_v48, %v2816_v21  ;;  %v2780_v27 = vrot.slane %v2716_v51, %v2993_v4  ;;  %vm5455_vm6 = vcmp.eq.s32.totalorder %v2772_v42, 1 }
 0x1c6   :  { %v2821_v31 = vsel %vm5444_vm5, %v5177_v19, 0.0  ;;  %v2822_v36 = vsel %vm5444_vm5, %v5179_v44, 0.0  ;;  %vm5465_vm7 = vcmp.eq.s32.totalorder %v2776_v25, 1  ;;  %v2823_v1 = vsel %vm5455_vm6, %v5193_v62, 0.0 }
 0x1c7   :  { %v2838_v14 = vadd.f32 %v2837_v38, %v2817_v37  ;;  %v2853_v22 = vadd.f32 %v2852_v45, %v2818_v63  ;;  %v2824_v6 = vsel %vm5455_vm6, %v5195_v29, 0.0  ;;  %vm2796_vm8 = vcmp.eq.s32.totalorder %v2780_v27, 1 }
 0x1c8   :  { %v2825_v44 = vsel %vm5465_vm7, %v5208_v58, 0.0  ;;  %v2826_v2 = vsel %vm5465_vm7, %v5210_v26, 0.0  ;;  %v2827_v32 = vsel %vm2796_vm8, %v5222_v35, 0.0  ;;  %v2828_v62 = vsel %vm2796_vm8, %v5224_v59, 0.0 }
 0x1c9   :  { %v2839_v23 = vadd.f32 %v2838_v14, %v2819_v5  ;;  %v2854_v4 = vadd.f32 %v2853_v22, %v2820_v46 }
 0x1cb   :  { %v2840_v19 = vadd.f32 %v2839_v23, %v2821_v31  ;;  %v2855_v43 = vadd.f32 %v2854_v4, %v2822_v36 }
 0x1cd   :  { %v2841_v33 = vadd.f32 %v2840_v19, %v2823_v1  ;;  %v2856_v8 = vadd.f32 %v2855_v43, %v2824_v6 }
 0x1cf   :  { %v2842_v29 = vadd.f32 %v2841_v33, %v2825_v44  ;;  %v2857_v39 = vadd.f32 %v2856_v8, %v2826_v2 }
 0x1d1   :  { %v2843_v3 = vadd.f32 %v2842_v29, %v2827_v32  ;;  %v2858_v15 = vadd.f32 %v2857_v39, %v2828_v62 }
 0x1d3   :  { %2859 = vst [vmem:[#allocation7 + $0x70] sm:$0xff] %v2843_v3  ;;  %2860 = vst [vmem:[#allocation7 + $0x78] sm:$0xff] %v2858_v15 }
 0x1d4   :  { %2939 = shalt.err (!%p2936_p0)
}
 0x1d5   :  { %2872 = dma.vmem_to_hbm [thread:$0]  %s2867_s1, 2048, %s5491_s2, [#allocation4], %s2956_s18, %s2956_s18, %s2957_s19  }
 0x1d6   :  { %2952 = dma.done.wait [#allocation4], 2048  }
 0x1d7   :  { %2953 = vsyncadd [#allocation4], 4294965248 }
 0x1d8   :  { %2876 = vsyncpa [#allocation3], 1 }
 0x1d9   :  { %2877 = vsyncpa [#allocation6], 1 }
 0x1da   :  { %2878 = vsyncpa [#allocation4], 1 }

</bundles_post_ra>
